<compile_context>
chip_gen: v7x
topology: tpu7x:2x2x1
jax: 0.10.0
libtpu: 0.0.40
codegen_flags: <defaults>
</compile_context>

<pallas_src>
import math

import jax
import jax.numpy as jnp
from jax import lax
from jax.experimental import pallas as pl
from jax.experimental.pallas import tpu as pltpu


def _vmem_limit_bytes():
    # Stay well under v7x's 64 MiB/TC; derive from the local chip when possible.
    try:
        cap = pltpu.get_tpu_info().vmem_capacity_bytes
        return min(48 * 1024 * 1024, int(cap * 3 // 4))
    except Exception:
        return 48 * 1024 * 1024


_VMEM_LIMIT = _vmem_limit_bytes()
_CP_PLAIN = pltpu.CompilerParams(vmem_limit_bytes=_VMEM_LIMIT)


def _vmem():
    return pl.BlockSpec(memory_space=pltpu.MemorySpace.VMEM)


# ---------------------------------------------------------------------------
# Kernel 1: fused bidirectional LSTM (PyTorch gate order i, f, g, o;
#   c' = f*c + i*g,  h' = o*tanh(c')).
# Grid axis 0 = direction (0 = forward, 1 = backward), marked "parallel" so the
# two independent directions shard across TensorCores on v7x.
# The input projection x@W_ih + b is hoisted into one big MXU matmul; the
# fori_loop keeps only h@W_hh plus elementwise gate math.
# ---------------------------------------------------------------------------
def _bilstm_kernel(x_ref, wih_ref, whh_ref, b_ref, y_ref, hn_ref, cn_ref, gx_ref):
    d = pl.program_id(0)
    T, bs, Din = x_ref.shape
    H = whh_ref.shape[1]

    # Hoisted input projection: one (T*bs, Din) x (Din, 4H) matmul.
    gx = jnp.dot(x_ref[...].reshape(T * bs, Din), wih_ref[0],
                 preferred_element_type=jnp.float32) + b_ref[0]
    gx_ref[...] = gx.reshape(T, bs, 4 * H)

    def step(t, carry):
        h, c = carry
        tt = jnp.where(d == 0, t, T - 1 - t)          # in-kernel reversal for bwd dir
        gates = gx_ref[tt] + jnp.dot(h, whh_ref[0],
                                     preferred_element_type=jnp.float32)
        i = jax.nn.sigmoid(gates[:, 0 * H:1 * H])
        f = jax.nn.sigmoid(gates[:, 1 * H:2 * H])
        g = jnp.tanh(gates[:, 2 * H:3 * H])
        o = jax.nn.sigmoid(gates[:, 3 * H:4 * H])
        c_new = f * c + i * g
        h_new = o * jnp.tanh(c_new)
        y_ref[tt] = h_new                              # straight into this dir's half
        return (h_new, c_new)

    h0 = jnp.zeros((bs, H), jnp.float32)
    c0 = jnp.zeros((bs, H), jnp.float32)
    h_n, c_n = lax.fori_loop(0, T, step, (h0, c0))
    hn_ref[0] = h_n
    cn_ref[0] = c_n


def bilstm(x_btd, p_fwd, p_bwd, H):
    bs, T, Din = x_btd.shape
    x_tbd = jnp.transpose(x_btd, (1, 0, 2))
    w_ih = jnp.stack([p_fwd['w_ih'], p_bwd['w_ih']], axis=0)       # (2, Din, 4H)
    w_hh = jnp.stack([p_fwd['w_hh'], p_bwd['w_hh']], axis=0)       # (2, H, 4H)
    b = jnp.stack([p_fwd['b'], p_bwd['b']], axis=0)                # (2, 1, 4H)

    y_tbh, h_n, c_n = pl.pallas_call(
        _bilstm_kernel,
        out_shape=(jax.ShapeDtypeStruct((T, bs, 2 * H), jnp.float32),
                   jax.ShapeDtypeStruct((2, bs, H), jnp.float32),
                   jax.ShapeDtypeStruct((2, bs, H), jnp.float32)),
        grid=(2,),
        in_specs=[pl.BlockSpec((T, bs, Din), lambda d: (0, 0, 0)),
                  pl.BlockSpec((1, Din, 4 * H), lambda d: (d, 0, 0)),
                  pl.BlockSpec((1, H, 4 * H), lambda d: (d, 0, 0)),
                  pl.BlockSpec((1, 1, 4 * H), lambda d: (d, 0, 0))],
        out_specs=(pl.BlockSpec((T, bs, H), lambda d: (0, 0, d)),
                   pl.BlockSpec((1, bs, H), lambda d: (d, 0, 0)),
                   pl.BlockSpec((1, bs, H), lambda d: (d, 0, 0))),
        scratch_shapes=[pltpu.VMEM((T, bs, 4 * H), jnp.float32)],
        compiler_params=pltpu.CompilerParams(
            dimension_semantics=("parallel",),
            vmem_limit_bytes=_VMEM_LIMIT),
    )(x_tbd, w_ih, w_hh, b)

    y = jnp.transpose(y_tbh, (1, 0, 2))                 # (bs, T, 2H)
    return y, h_n, c_n                                  # h_n/c_n: (2, bs, H) like PyTorch


# ---------------------------------------------------------------------------
# Kernel 2: spatial sum of conv4 features + broadcast add of fc2 hidden state.
#   ac4:  (bs, seq, hw, 512),  bias: (bs, 1, 512)  ->  (bs, seq, 512)
# Gridded over batch ("parallel") so realistic ac4 never has to be fully
# VMEM-resident and the mem-bound pass is double-buffered.
# ---------------------------------------------------------------------------
def _spatial_sum_add_kernel(ac4_ref, bias_ref, out_ref):
    out_ref[...] = jnp.sum(ac4_ref[...], axis=2) + bias_ref[...]


# ---------------------------------------------------------------------------
# Kernel 3: fused training decoder (attention + LSTM cell), hidden states only.
# Per step t: ctx = attention(h_t, enc); input = [ctx, word_t]; LSTM cell
# (hidden 512).  Word-input projection and attention encoder projection are
# hoisted into single matmuls before the loop; the vocab projection is done
# afterwards by a separate tiled kernel.  Attending at the top of each step
# reproduces the PyTorch loop (ctx_0 = attend(h0)) while skipping the unused
# final attention pass.  The short fixed loop is unrolled for scheduling.
# ---------------------------------------------------------------------------
def _decoder_kernel(words_ref, h0_ref, c0_ref, enc_ref,
                    wihc_ref, wihw_ref, whh_ref, b_ref,
                    w1e_ref, w1h_ref, b1_ref, w2_ref,
                    hseq_ref, gw_ref, eproj_ref):
    Tdec, bs, dw = words_ref.shape
    _, T_enc, D = enc_ref.shape
    Hd = h0_ref.shape[-1]

    # Hoisted word-input projection (one MXU matmul for all decoder steps) + bias.
    gw = jnp.dot(words_ref[...].reshape(Tdec * bs, dw), wihw_ref[...],
                 preferred_element_type=jnp.float32) + b_ref[...]
    gw_ref[...] = gw.reshape(Tdec, bs, 4 * Hd)

    # Hoisted attention encoder projection (shared across all steps).
    eproj = jnp.dot(enc_ref[...].reshape(bs * T_enc, D), w1e_ref[...],
                    preferred_element_type=jnp.float32) + b1_ref[...]
    eproj_ref[...] = eproj.reshape(bs, T_enc, D)

    def attend(h):
        hp = jnp.dot(h, w1h_ref[...], preferred_element_type=jnp.float32)
        pre = jnp.tanh(eproj_ref[...] + hp[:, None, :])            # (bs, T_enc, D)
        scores = jnp.sum(pre * w2_ref[...], axis=-1)               # (bs, T_enc)
        m = jnp.max(scores, axis=-1, keepdims=True)
        e = jnp.exp(scores - m)
        inv = pl.reciprocal(jnp.sum(e, axis=-1, keepdims=True), approx=True)
        alpha = e * inv
        ctx = jnp.einsum('bqt,btd->bqd', alpha[:, None, :], enc_ref[...],
                         preferred_element_type=jnp.float32)       # MXU contraction
        return ctx[:, 0, :]                                        # (bs, D)

    def step(t, carry):
        h, c = carry
        ctx = attend(h)                                            # attend at top of step
        gates = (gw_ref[t]
                 + jnp.dot(ctx, wihc_ref[...], preferred_element_type=jnp.float32)
                 + jnp.dot(h, whh_ref[...], preferred_element_type=jnp.float32))
        i = jax.nn.sigmoid(gates[:, 0 * Hd:1 * Hd])
        f = jax.nn.sigmoid(gates[:, 1 * Hd:2 * Hd])
        g = jnp.tanh(gates[:, 2 * Hd:3 * Hd])
        o = jax.nn.sigmoid(gates[:, 3 * Hd:4 * Hd])
        c_new = f * c + i * g
        h_new = o * jnp.tanh(c_new)
        hseq_ref[t] = h_new
        return (h_new, c_new)

    # Short fixed-trip decoder loop: unroll so the LLO scheduler sees across steps.
    lax.fori_loop(0, Tdec, step, (h0_ref[...], c0_ref[...]), unroll=True)


# ---------------------------------------------------------------------------
# Kernel 4: vocab output projection, tiled over the vocab dimension so out_w is
# never fully VMEM-resident and stores are lane-dense bulk writes.
# ---------------------------------------------------------------------------
def _out_proj_kernel(h_ref, w_ref, b_ref, o_ref):
    o_ref[...] = (jnp.dot(h_ref[...], w_ref[...], preferred_element_type=jnp.float32)
                  + b_ref[...])


def output_projection(h_flat, out_w, out_b):
    M, Hd = h_flat.shape
    vocab = out_w.shape[-1]
    vt = vocab
    for cand in (512, 256, 128):
        if vocab % cand == 0:
            vt = cand
            break
    return pl.pallas_call(
        _out_proj_kernel,
        out_shape=jax.ShapeDtypeStruct((M, vocab), jnp.float32),
        grid=(vocab // vt,),
        in_specs=[pl.BlockSpec((M, Hd), lambda j: (0, 0)),
                  pl.BlockSpec((Hd, vt), lambda j: (0, j)),
                  pl.BlockSpec((1, vt), lambda j: (0, j))],
        out_specs=pl.BlockSpec((M, vt), lambda j: (0, j)),
        compiler_params=pltpu.CompilerParams(
            dimension_semantics=("parallel",),
            vmem_limit_bytes=_VMEM_LIMIT),
    )(h_flat, out_w, out_b)


# ---------------------------------------------------------------------------
# Full forward (mode='train')
# ---------------------------------------------------------------------------
def multimodal_att3_forward(params, ac4, afc2, target_variable, max_len, dim_hidden=256):
    bs, seq_len, sh, sw, c4_dim = ac4.shape
    H = dim_hidden

    # fc2_encoder (bidirectional LSTM, input 128, hidden H)
    _, fc2_hn, _ = bilstm(afc2, params['fc2_fwd'], params['fc2_bwd'], H)
    # reproduce `fc2_hidden_state.view(bs, -1)` (raw row-major reshape of (2,bs,H))
    fc2_hidden = jnp.reshape(fc2_hn, (bs, 2 * H))                  # (bs, 512)

    # ac4 spatial sum + broadcast add of fc2 hidden (gridded Pallas kernel)
    ac4_r = ac4.reshape(bs, seq_len, sh * sw, c4_dim)
    ac4_sum = pl.pallas_call(
        _spatial_sum_add_kernel,
        out_shape=jax.ShapeDtypeStruct((bs, seq_len, c4_dim), jnp.float32),
        grid=(bs,),
        in_specs=[pl.BlockSpec((1, seq_len, sh * sw, c4_dim), lambda b: (b, 0, 0, 0)),
                  pl.BlockSpec((1, 1, c4_dim), lambda b: (b, 0, 0))],
        out_specs=pl.BlockSpec((1, seq_len, c4_dim), lambda b: (b, 0, 0)),
        compiler_params=pltpu.CompilerParams(
            dimension_semantics=("parallel",),
            vmem_limit_bytes=_VMEM_LIMIT),
    )(ac4_r, fc2_hidden.reshape(bs, 1, c4_dim))

    # conv4_encoder (bidirectional LSTM, input 512, hidden H)
    c4_out, c4_hn, c4_cn = bilstm(ac4_sum, params['c4_fwd'], params['c4_bwd'], H)
    # reproduce `.view(1, bs, -1)` raw reshapes
    dec_h0 = jnp.reshape(c4_hn, (1, bs, 2 * H))[0]                 # (bs, 512)
    dec_c0 = jnp.reshape(c4_cn, (1, bs, 2 * H))[0]                 # (bs, 512)

    # fused decoder: attention + LSTM over max_len-1 steps (hidden states only)
    Tdec = max_len - 1
    Hd = 2 * H
    words = jnp.take(params['embedding'], target_variable[:, :Tdec], axis=0)  # (bs, Tdec, dw)
    words_t = jnp.transpose(words, (1, 0, 2))                      # (Tdec, bs, dw)
    T_enc = c4_out.shape[1]

    hseq_t = pl.pallas_call(
        _decoder_kernel,
        out_shape=jax.ShapeDtypeStruct((Tdec, bs, Hd), jnp.float32),
        in_specs=[_vmem()] * 12,
        out_specs=_vmem(),
        scratch_shapes=[pltpu.VMEM((Tdec, bs, 4 * Hd), jnp.float32),
                        pltpu.VMEM((bs, T_enc, Hd), jnp.float32)],
        compiler_params=_CP_PLAIN,
    )(words_t, dec_h0, dec_c0, c4_out,
      params['dec_wih_ctx'], params['dec_wih_word'], params['dec_whh'], params['dec_b'],
      params['att_w1e'], params['att_w1h'], params['att_b1'], params['att_w2'])

    # vocab projection as one big, vocab-tiled matmul
    vocab = params['out_w'].shape[-1]
    logits = output_projection(hseq_t.reshape(Tdec * bs, Hd),
                               params['out_w'], params['out_b'])
    seq_probs = jnp.transpose(logits.reshape(Tdec, bs, vocab), (1, 0, 2))  # (bs, Tdec, vocab)
    seq_preds = []                                                 # train mode returns empty preds
    return seq_probs, seq_preds


# ---------------------------------------------------------------------------
# Deterministic parameter initialization (shapes follow the module __init__).
# ---------------------------------------------------------------------------
def init_params(key, vocab_size, dim_word, dim_hidden):
    H = dim_hidden
    keys = list(jax.random.split(key, 32))
    kit = iter(keys)

    def unif(shape, scale):
        return jax.random.uniform(next(kit), shape, jnp.float32, -scale, scale)

    def lstm_dir(din, h):
        s = 1.0 / math.sqrt(h)
        return dict(w_ih=unif((din, 4 * h), s),
                    w_hh=unif((h, 4 * h), s),
                    b=unif((1, 4 * h), s))        # b_ih + b_hh folded together

    p = {}
    p['fc2_fwd'] = lstm_dir(128, H)
    p['fc2_bwd'] = lstm_dir(128, H)
    p['c4_fwd'] = lstm_dir(512, H)
    p['c4_bwd'] = lstm_dir(512, H)

    Hd = 2 * H                                    # decoder hidden = 512
    sd = 1.0 / math.sqrt(Hd)
    p['dec_wih_ctx'] = unif((512, 4 * Hd), sd)    # context part of decoder input
    p['dec_wih_word'] = unif((dim_word, 4 * Hd), sd)
    p['dec_whh'] = unif((Hd, 4 * Hd), sd)
    p['dec_b'] = unif((1, 4 * Hd), sd)

    sa = 1.0 / math.sqrt(2 * 512)                 # Attention(512): Linear(1024, 512)
    p['att_w1e'] = unif((512, 512), sa)
    p['att_w1h'] = unif((512, 512), sa)
    p['att_b1'] = unif((1, 512), sa)
    p['att_w2'] = unif((1, 512), 1.0 / math.sqrt(512))  # Linear(512, 1, bias=False)

    so = 1.0 / math.sqrt(512)
    p['out_w'] = unif((512, vocab_size), so)
    p['out_b'] = unif((1, vocab_size), so)

    # stand-in for the pretrained fasttext embedding table
    p['embedding'] = jax.random.normal(next(kit), (vocab_size, dim_word), jnp.float32)
    return p


if __name__ == "__main__":
    key = jax.random.PRNGKey(0)
    k1, k2, k3, kp = jax.random.split(key, 4)

    # small shapes; dim_hidden=256 is forced by the module (2*dim_hidden must equal 512)
    bs, seq_len, sp = 2, 4, 2
    T_fc2 = 6
    vocab_size, max_len, dim_hidden, dim_word = 128, 5, 256, 64

    ac4 = jax.random.normal(k1, (bs, seq_len, sp, sp, 512), jnp.float32)
    afc2 = jax.random.normal(k2, (bs, T_fc2, 128), jnp.float32)
    target = jax.random.randint(k3, (bs, max_len), 0, vocab_size, dtype=jnp.int32)

    params = init_params(kp, vocab_size, dim_word, dim_hidden)

    seq_probs, seq_preds = multimodal_att3_forward(
        params, ac4, afc2, target, max_len, dim_hidden)
    jax.block_until_ready(seq_probs)
    assert seq_probs.shape == (bs, max_len - 1, vocab_size)
    print("KERNEL_OK")
</pallas_src>

<mosaic_0001>
module attributes {stable_mosaic.version = 11 : i64} {
  func.func @_bilstm_kernel(%arg0: i32, %arg1: memref<6x2x128xf32, #tpu.memory_space<vmem>>, %arg2: memref<1x128x1024xf32, #tpu.memory_space<vmem>>, %arg3: memref<1x256x1024xf32, #tpu.memory_space<vmem>>, %arg4: memref<1x1x1024xf32, #tpu.memory_space<vmem>>, %arg5: memref<6x2x256xf32, #tpu.memory_space<vmem>>, %arg6: memref<1x2x256xf32, #tpu.memory_space<vmem>>, %arg7: memref<1x2x256xf32, #tpu.memory_space<vmem>>, %arg8: memref<6x2x1024xf32, #tpu.memory_space<vmem>>) attributes {dimension_semantics = [#tpu.dimension_semantics<parallel>], iteration_bounds = array<i64: 2>, scalar_prefetch = 0 : i64, scratch_operands = 1 : i64, tpu.core_type = #tpu.core_type<tc>, window_params = [{pipeline_mode = #tpu.pipeline_mode<synchronous>, transform_indices = @transform_0, window_bounds = array<i64: 6, 2, 128>}, {transform_indices = @transform_1, window_bounds = array<i64: 1, 128, 1024>}, {transform_indices = @transform_2, window_bounds = array<i64: 1, 256, 1024>}, {transform_indices = @transform_3, window_bounds = array<i64: 1, 1, 1024>}, {transform_indices = @transform_4, window_bounds = array<i64: 6, 2, 256>}, {transform_indices = @transform_5, window_bounds = array<i64: 1, 2, 256>}, {transform_indices = @transform_6, window_bounds = array<i64: 1, 2, 256>}]} {
    %c0 = arith.constant 0 : index
    %c0_0 = arith.constant 0 : index
    %c0_1 = arith.constant 0 : index
    %0 = vector.load %arg1[%c0, %c0_0, %c0_1] : memref<6x2x128xf32, #tpu.memory_space<vmem>>, vector<6x2x128xf32>
    %1 = vector.shape_cast %0 : vector<6x2x128xf32> to vector<12x128xf32>
    %c0_2 = arith.constant 0 : index
    %c0_3 = arith.constant 0 : index
    %c0_4 = arith.constant 0 : index
    %2 = vector.load %arg2[%c0_2, %c0_3, %c0_4] : memref<1x128x1024xf32, #tpu.memory_space<vmem>>, vector<1x128x1024xf32>
    %3 = vector.shape_cast %2 : vector<1x128x1024xf32> to vector<128x1024xf32>
    %cst = arith.constant dense<0.000000e+00> : vector<12x1024xf32>
    %4 = tpu.matmul %1, %3, %cst {dimension_numbers = #tpu.dot_dimension_numbers<[1], [0], [0], [1], [0, 0, 1, 1], [], []>} : vector<12x128xf32>, vector<128x1024xf32>, vector<12x1024xf32> -> vector<12x1024xf32>
    %c0_5 = arith.constant 0 : index
    %c0_6 = arith.constant 0 : index
    %c0_7 = arith.constant 0 : index
    %5 = vector.load %arg4[%c0_5, %c0_6, %c0_7] : memref<1x1x1024xf32, #tpu.memory_space<vmem>>, vector<1x1x1024xf32>
    %6 = vector.shape_cast %5 : vector<1x1x1024xf32> to vector<1x1024xf32>
    %7 = vector.broadcast %6 : vector<1x1024xf32> to vector<12x1024xf32>
    %8 = arith.addf %4, %7 : vector<12x1024xf32>
    %9 = vector.shape_cast %8 : vector<12x1024xf32> to vector<6x2x1024xf32>
    %c0_8 = arith.constant 0 : index
    %c0_9 = arith.constant 0 : index
    %c0_10 = arith.constant 0 : index
    %10 = vector.load %arg8[%c0_8, %c0_9, %c0_10] : memref<6x2x1024xf32, #tpu.memory_space<vmem>>, vector<6x2x1024xf32>
    tpu.vector_store %arg8[%c0_8, %c0_9, %c0_10], %9 {strides = array<i32>} : memref<6x2x1024xf32, #tpu.memory_space<vmem>>, vector<6x2x1024xf32>,
    %cst_11 = arith.constant 0.000000e+00 : f32
    %11 = vector.broadcast %cst_11 : f32 to vector<2x256xf32>
    %cst_12 = arith.constant 0.000000e+00 : f32
    %12 = vector.broadcast %cst_12 : f32 to vector<2x256xf32>
    %c0_i32 = arith.constant 0 : i32
    %c6_i32 = arith.constant 6 : i32
    %13 = arith.addi %c0_i32, %c6_i32 : i32
    %c1_i32 = arith.constant 1 : i32
    %14:2 = scf.for %arg9 = %c0_i32 to %13 step %c1_i32 iter_args(%arg10 = %11, %arg11 = %12) -> (vector<2x256xf32>, vector<2x256xf32>)  : i32 {
      %c0_i32_20 = arith.constant 0 : i32
      %21 = arith.cmpi eq, %arg0, %c0_i32_20 : i32
      %c5_i32 = arith.constant 5 : i32
      %22 = arith.subi %c5_i32, %arg9 : i32
      %23 = arith.select %21, %arg9, %22 : i32
      %24 = arith.index_cast %23 : i32 to index
      %c0_21 = arith.constant 0 : index
      %c0_22 = arith.constant 0 : index
      %25 = vector.load %arg8[%24, %c0_21, %c0_22] : memref<6x2x1024xf32, #tpu.memory_space<vmem>>, vector<1x2x1024xf32>
      %26 = vector.shape_cast %25 : vector<1x2x1024xf32> to vector<2x1024xf32>
      %c0_23 = arith.constant 0 : index
      %c0_24 = arith.constant 0 : index
      %c0_25 = arith.constant 0 : index
      %27 = vector.load %arg3[%c0_23, %c0_24, %c0_25] : memref<1x256x1024xf32, #tpu.memory_space<vmem>>, vector<1x256x1024xf32>
      %28 = vector.shape_cast %27 : vector<1x256x1024xf32> to vector<256x1024xf32>
      %cst_26 = arith.constant dense<0.000000e+00> : vector<2x1024xf32>
      %29 = tpu.matmul %arg10, %28, %cst_26 {dimension_numbers = #tpu.dot_dimension_numbers<[1], [0], [0], [1], [0, 0, 1, 1], [], []>} : vector<2x256xf32>, vector<256x1024xf32>, vector<2x1024xf32> -> vector<2x1024xf32>
      %30 = arith.addf %26, %29 : vector<2x1024xf32>
      %31 = vector.extract_strided_slice %30 {offsets = [0, 0], sizes = [2, 256], strides = [1, 1]} : vector<2x1024xf32> to vector<2x256xf32>
      %32 = arith.negf %31 : vector<2x256xf32>
      %33 = math.exp %32 : vector<2x256xf32>
      %cst_27 = arith.constant 1.000000e+00 : f32
      %34 = vector.broadcast %cst_27 : f32 to vector<2x256xf32>
      %35 = arith.addf %34, %33 : vector<2x256xf32>
      %36 = arith.divf %34, %35 : vector<2x256xf32>
      %37 = vector.extract_strided_slice %30 {offsets = [0, 256], sizes = [2, 256], strides = [1, 1]} : vector<2x1024xf32> to vector<2x256xf32>
      %38 = arith.negf %37 : vector<2x256xf32>
      %39 = math.exp %38 : vector<2x256xf32>
      %cst_28 = arith.constant 1.000000e+00 : f32
      %40 = vector.broadcast %cst_28 : f32 to vector<2x256xf32>
      %41 = arith.addf %40, %39 : vector<2x256xf32>
      %42 = arith.divf %40, %41 : vector<2x256xf32>
      %43 = vector.extract_strided_slice %30 {offsets = [0, 512], sizes = [2, 256], strides = [1, 1]} : vector<2x1024xf32> to vector<2x256xf32>
      %44 = math.tanh %43 : vector<2x256xf32>
      %45 = vector.extract_strided_slice %30 {offsets = [0, 768], sizes = [2, 256], strides = [1, 1]} : vector<2x1024xf32> to vector<2x256xf32>
      %46 = arith.negf %45 : vector<2x256xf32>
      %47 = math.exp %46 : vector<2x256xf32>
      %cst_29 = arith.constant 1.000000e+00 : f32
      %48 = vector.broadcast %cst_29 : f32 to vector<2x256xf32>
      %49 = arith.addf %48, %47 : vector<2x256xf32>
      %50 = arith.divf %48, %49 : vector<2x256xf32>
      %51 = arith.mulf %42, %arg11 : vector<2x256xf32>
      %52 = arith.mulf %36, %44 : vector<2x256xf32>
      %53 = arith.addf %51, %52 : vector<2x256xf32>
      %54 = math.tanh %53 : vector<2x256xf32>
      %55 = arith.mulf %50, %54 : vector<2x256xf32>
      %56 = arith.index_cast %23 : i32 to index
      %c0_30 = arith.constant 0 : index
      %c0_31 = arith.constant 0 : index
      %57 = vector.load %arg5[%56, %c0_30, %c0_31] : memref<6x2x256xf32, #tpu.memory_space<vmem>>, vector<1x2x256xf32>
      %58 = vector.shape_cast %57 : vector<1x2x256xf32> to vector<2x256xf32>
      %59 = vector.shape_cast %55 : vector<2x256xf32> to vector<1x2x256xf32>
      tpu.vector_store %arg5[%56, %c0_30, %c0_31], %59 {strides = array<i32>} : memref<6x2x256xf32, #tpu.memory_space<vmem>>, vector<1x2x256xf32>,
      scf.yield %55, %53 : vector<2x256xf32>, vector<2x256xf32>
    }
    %c6_i32_13 = arith.constant 6 : i32
    %c0_14 = arith.constant 0 : index
    %c0_15 = arith.constant 0 : index
    %c0_16 = arith.constant 0 : index
    %15 = vector.load %arg6[%c0_14, %c0_15, %c0_16] : memref<1x2x256xf32, #tpu.memory_space<vmem>>, vector<1x2x256xf32>
    %16 = vector.shape_cast %15 : vector<1x2x256xf32> to vector<2x256xf32>
    %17 = vector.shape_cast %14#0 : vector<2x256xf32> to vector<1x2x256xf32>
    tpu.vector_store %arg6[%c0_14, %c0_15, %c0_16], %17 {strides = array<i32>} : memref<1x2x256xf32, #tpu.memory_space<vmem>>, vector<1x2x256xf32>,
    %c0_17 = arith.constant 0 : index
    %c0_18 = arith.constant 0 : index
    %c0_19 = arith.constant 0 : index
    %18 = vector.load %arg7[%c0_17, %c0_18, %c0_19] : memref<1x2x256xf32, #tpu.memory_space<vmem>>, vector<1x2x256xf32>
    %19 = vector.shape_cast %18 : vector<1x2x256xf32> to vector<2x256xf32>
    %20 = vector.shape_cast %14#1 : vector<2x256xf32> to vector<1x2x256xf32>
    tpu.vector_store %arg7[%c0_17, %c0_18, %c0_19], %20 {strides = array<i32>} : memref<1x2x256xf32, #tpu.memory_space<vmem>>, vector<1x2x256xf32>,
    return
  }
  func.func @transform_0(%arg0: i32) -> (i32, i32, i32) {
    %c0_i32 = arith.constant 0 : i32
    %c0_i32_0 = arith.constant 0 : i32
    %c0_i32_1 = arith.constant 0 : i32
    %c0_i32_2 = arith.constant 0 : i32
    return %c0_i32, %c0_i32_0, %c0_i32_1 : i32, i32, i32
  }
  func.func @transform_1(%arg0: i32) -> (i32, i32, i32) {
    %c0_i32 = arith.constant 0 : i32
    %c0_i32_0 = arith.constant 0 : i32
    %c0_i32_1 = arith.constant 0 : i32
    return %arg0, %c0_i32, %c0_i32_0 : i32, i32, i32
  }
  func.func @transform_2(%arg0: i32) -> (i32, i32, i32) {
    %c0_i32 = arith.constant 0 : i32
    %c0_i32_0 = arith.constant 0 : i32
    %c0_i32_1 = arith.constant 0 : i32
    return %arg0, %c0_i32, %c0_i32_0 : i32, i32, i32
  }
  func.func @transform_3(%arg0: i32) -> (i32, i32, i32) {
    %c0_i32 = arith.constant 0 : i32
    %c0_i32_0 = arith.constant 0 : i32
    %c0_i32_1 = arith.constant 0 : i32
    return %arg0, %c0_i32, %c0_i32_0 : i32, i32, i32
  }
  func.func @transform_4(%arg0: i32) -> (i32, i32, i32) {
    %c0_i32 = arith.constant 0 : i32
    %c0_i32_0 = arith.constant 0 : i32
    %c0_i32_1 = arith.constant 0 : i32
    return %c0_i32, %c0_i32_0, %arg0 : i32, i32, i32
  }
  func.func @transform_5(%arg0: i32) -> (i32, i32, i32) {
    %c0_i32 = arith.constant 0 : i32
    %c0_i32_0 = arith.constant 0 : i32
    %c0_i32_1 = arith.constant 0 : i32
    return %arg0, %c0_i32, %c0_i32_0 : i32, i32, i32
  }
  func.func @transform_6(%arg0: i32) -> (i32, i32, i32) {
    %c0_i32 = arith.constant 0 : i32
    %c0_i32_0 = arith.constant 0 : i32
    %c0_i32_1 = arith.constant 0 : i32
    return %arg0, %c0_i32, %c0_i32_0 : i32, i32, i32
  }
}

</mosaic_0001>

<bundles_post_ra>
// kernel: tpu_custom_call.1
= control target key start
LH: loop header
LB: loop body
LE: loop exit
PB: predicated region body
PF: predicated region fallthrough
CT: control target
= control target key end

     0   :  { %s3690_s0 = inlined_call_operand.hbm [shape: f32[6,2,128], index: 0, kind: input, shape index: {}]   ;;  %s3691_s1 = inlined_call_operand.hbm [shape: f32[2,128,1024], index: 1, kind: input, shape index: {}]   ;;  %s3692_s2 = inlined_call_operand.hbm [shape: f32[2,256,1024], index: 2, kind: input, shape index: {}]   ;;  %s3693_s3 = inlined_call_operand.hbm [shape: f32[2,1,1024], index: 3, kind: input, shape index: {}]   ;;  %s3694_s4 = inlined_call_operand.hbm [shape: f32[6,2,512], index: 4, kind: output, shape index: {0}]   ;;  %s3695_s5 = inlined_call_operand.hbm [shape: f32[2,2,256], index: 5, kind: output, shape index: {1}]   ;;  %s3696_s6 = inlined_call_operand.hbm [shape: f32[2,2,256], index: 6, kind: output, shape index: {2}]  }
   0x1   :  { %3713 = sst [smem:[#allocation24_spill]] %s3691_s1 }
   0x2   :  { %12 = vsyncpa [#allocation4], 0 }
   0x3   :  { %13 = vsyncpa [#allocation7], 0 }
   0x4   :  { %15 = vsyncpa [#allocation7 + $0x1], 0 }
   0x5   :  { %16 = vsyncpa [#allocation10], 0 }
   0x6   :  { %18 = vsyncpa [#allocation10 + $0x1], 0 }
   0x7   :  { %19 = vsyncpa [#allocation5], 0 }
   0x8   :  { %21 = vsyncpa [#allocation5 + $0x1], 0 }
   0x9   :  { %22 = vsyncpa [#allocation13], 0 }
   0xa   :  { %24 = vsyncpa [#allocation13 + $0x1], 0  ;;  %s2834_s21 = smov 0   ;;  %s2836_s22 = smov 0  }
   0xb   :  { %s2838_s23 = smov 0   ;;  %s2840_s24 = smov 0  }
   0xc LB: > { %3714 = sst [smem:[#allocation20_spill]] %s2765_s23  ;;  %s2855_s25 = sadd.s32 1, %s2769_s24   ;;  %s2769_s24 = sphi %s2840_s24, %s3744_s24   ;;  %s2765_s23 = sphi %s2838_s23, %s3746_s23   ;;  %s2761_s22 = sphi %s2836_s22, %s3748_s22   ;;  %s2757_s21 = sphi %s2834_s21, %s3747_s21  }
   0xd   : > { %3715 = sst [smem:[#allocation21_spill]] %s2855_s25  ;;  %s58_s26 = sadd.s32 1, %s2765_s23 }
   0xe   : > { %s55_s27 = ssub.s32 %s2769_s24, %s2855_s25  ;;  %p3697_p0 = scmp.ne.s32.totalorder %s2765_s23, %s2761_s22 }
   0xf   : > { %p56_p1 = scmp.eq.s32.totalorder %s55_s27, 0  ;;  %p66_p2 = scmp.eq.s32.totalorder %s2769_s24, 0 }
  0x10   : > { %p2420_p4 = scmp.lt.s32.totalorder %s2769_s24, 2  ;;  %s238_s29 = sand.u32 1, %s2769_s24  }
  0x11   : > { %s2866_s28 = scalar_select %p56_p1, %s2765_s23, %s58_s26  }
  0x12   : > { %p67_p5 = por %p66_p2, %p3697_p0  ;;  %s2873_s30 = sand.u32 1, %s2765_s23  }
  0x13   : > { %3716 = sst [smem:[#allocation22_spill]] %s2866_s28  ;;  %s1953_s7 = sshll.u32 %s2873_s30, 10 }
  0x14   : > { %s1986_s8 = sshll.u32 %s2769_s24, 14  ;;  %s3717_s1 = sld [smem:[#allocation24_spill]] }
  0x15   : > { %s242_s12 = scalar_lea.vmem [#allocation6], %s1953_s7  ;;  %p2882_p6 = pnand %p2420_p4, %p67_p5 }
  0x16   : > { %s249_s13 = sshll.u32 %s242_s12, 4  ;;  %s2888_s15 = scalar_lea.sflag [#allocation7], %s238_s29  ;;  %s2886_s13 = int_to_ptr.vmem [resolvable:$true] %s249_s13 }
  0x17   : > { %s3718_s14 = scalar_select %p2882_p6, 1, 0 }
  0x18   : > { %p2894_p8 = pneg %p2882_p6 }
  0x1a   : > { %s2880_s11 = scalar_lea.hbm %s3717_s1, %s1986_s8  ;;  %s2510_s20 = scalar_lea.hbm %s3717_s1, 32768 }
  0x1b   : > { %s2505_s16 = scalar_lea.hbm %s2880_s11, 16384  ;;  %p2511_p11 = scmp.lt.u32.totalorder %s2880_s11, %s3717_s1 }
  0x1c   : > { %p2506_p7 = scmp.ne.s32.totalorder %s2880_s11, %s2505_s16  ;;  %p2512_p12 = scmp.lt.u32.totalorder %s2510_s20, %s2505_s16 }
  0x1d   : > { %s3719_s17 = scalar_select %p2894_p8, 1, 0 }
  0x1e   : > { %p2508_p9 = pnand %p2894_p8, %p2506_p7  ;;  %p2513_p13 = por %p2512_p12, %p2511_p11 }
  0x1f   : > { %p2514_p1 = scmp.lt.u32.totalorder %s2505_s16, %s2880_s11 }
  0x20   : > { %p2509_p10 = pneg %p2508_p9 }
  0x21   : > { %p2515_p2 = por %p2514_p1, %p2513_p13 }
  0x23   : > { %p2516_p4 = pnand %p2515_p2, %p2509_p10 }
  0x25   : > { %2519 = shalt.err (!%p2516_p4)
}
  0x26   : > { %s2520_s29 = scalar_lea.vmem %s2886_s13, 16384  ;;  %s2783_s7 = smov [#allocation6]  }
  0x27   : > { %p2521_p5 = scmp.ne.s32.totalorder %s2886_s13, %s2520_s29  ;;  %s2525_s8 = sshll.u32 %s2783_s7, 4  ;;  %s2526_s8 = int_to_ptr.vmem [resolvable:$false] %s2525_s8 }
  0x28   : > { %s2527_s9 = scalar_lea.vmem %s2526_s8, 32768  ;;  %p2528_p3 = scmp.lt.s32.totalorder %s2886_s13, %s2526_s8 }
  0x29   : > { %p2523_p7 = pnand %p2521_p5, %p2894_p8  ;;  %p2529_p0 = scmp.lt.s32.totalorder %s2527_s9, %s2520_s29 }
  0x2b   : > { %p2524_p9 = pneg %p2523_p7  ;;  %p2530_p11 = por %p2529_p0, %p2528_p3 }
  0x2d   : > { %p2531_p12 = pnand %p2530_p11, %p2524_p9 }
  0x2f   : > { %2534 = shalt.err (!%p2531_p12)
}
  0x30   : > { %s3699_s10 = smov 1024   ;;  %s3700_s12 = smov 64  }
  0x31   : > { %2402 = dma.hbm_to_vmem [thread:$0]  (!%p2882_p6), %s2880_s11, 16384, %s2886_s13, %s2888_s15, %s3699_s10, %s3699_s10, %s3700_s12  }
  0x32   : > { %s2922_s16 = sadd.s32 4294967295, %s2769_s24   ;;  %s3698_s18 = sadd.s32 4294967294, %s2769_s24  }
  0x33   : > { %p71_p0 = scmp.ne.s32.totalorder %s2761_s22, %s2757_s21  ;;  %p3705_p3 = scmp.eq.s32.totalorder %s2922_s16, 0 }
  0x34   : > { %p147_p10 = scmp.eq.s32.totalorder %s2922_s16, 1  ;;  %p153_p13 = scmp.eq.s32.totalorder %s3698_s18, 1 }
  0x35   : > { %p2933_p1 = por %p3705_p3, %p71_p0  ;;  %p1950_p2 = scmp.ge.s32.totalorder %s2769_s24, 1 }
  0x36   : > { %p3721_p4 = scmp.ne.s32.totalorder %s2765_s23, %s2761_s22  ;;  %p2945_p7 = por %p153_p13, %p71_p0 }
  0x37   : > { %s3720_s19 = scalar_select %p2933_p1, 1, 0 }
  0x38   : > { %p2941_p5 = por %p147_p10, %p3721_p4  ;;  %p212_p9 = scmp.lt.s32.totalorder %s2769_s24, 3 }
  0x39   : > { %s3723_s13 = scalar_select %p2945_p7, 1, 0 }
  0x3a   : > { %s3722_s11 = scalar_select %p2941_p5, 1, 0 }
  0x3b   : > { %3724 = sst [smem:[#allocation23_spill]] %s3723_s13  ;;  %p2950_p11 = pnand %p1950_p2, %p212_p9 }
  0x3c   : > { %s2786_s26 = smov [#allocation3]   ;;  %s1956_s29 = sshll.u32 %s2873_s30, 11 }
  0x3d   : > { %s3725_s20 = scalar_select %p2950_p11, 1, 0 }
  0x3e   : > { %s224_s27 = sshll.u32 %s2786_s26, 4  ;;  %p2395_p12 = pneg %p2950_p11  ;;  %s2954_s27 = int_to_ptr.vmem [resolvable:$true] %s224_s27 }
  0x3f   : > { %s1987_s7 = sshll.u32 %s2769_s24, 15  ;;  %s263_s12 = scalar_lea.vmem [#allocation8], %s1956_s29 }
  0x40   : > { %p2962_p10 = pnand %p2395_p12, %p3705_p3  ;;  %s2969_s10 = scalar_lea.hbm %s3692_s2, %s1987_s7 }
  0x41   : > { %s270_s1 = sshll.u32 %s263_s12, 4  ;;  %s2535_s23 = scalar_lea.hbm %s3690_s0, 192  ;;  %s2971_s1 = int_to_ptr.vmem [resolvable:$true] %s270_s1 }
  0x42   : > { %p2536_p0 = scmp.ne.s32.totalorder %s3690_s0, %s2535_s23  ;;  %p2537_p13 = pneg %p2962_p10 }
  0x43   : > { %p2542_p9 = scmp.lt.u32.totalorder %s2535_s23, %s3690_s0 }
  0x44   : > { %p2538_p2 = pnand %p2537_p13, %p2536_p0 }
  0x46   : > { %p2539_p4 = pneg %p2538_p2 }
  0x48   : > { %p2544_p12 = pnand %p2542_p9, %p2539_p4 }
  0x4a   : > { %2547 = shalt.err (!%p2544_p12)
}
  0x4b   : > { %s2548_s12 = scalar_lea.vmem %s2954_s27, 192  ;;  %p2556_p1 = scmp.lt.s32.totalorder %s2954_s27, %s2954_s27 }
  0x4c   : > { %p2549_p3 = scmp.ne.s32.totalorder %s2954_s27, %s2548_s12  ;;  %p2557_p11 = scmp.lt.s32.totalorder %s2548_s12, %s2548_s12 }
  0x4e   : > { %p2551_p7 = pnand %p2549_p3, %p2537_p13  ;;  %p2558_p6 = por %p2557_p11, %p2556_p1 }
  0x50   : > { %p2552_p5 = pneg %p2551_p7 }
  0x52   : > { %p2559_p8 = pnand %p2558_p6, %p2552_p5 }
  0x54   : > { %2562 = shalt.err (!%p2559_p8)
}
  0x55   : > { %s2787_s25 = smov 32   ;;  %s2788_s23 = smov 2  }
  0x56   : > { %2398 = dma.hbm_to_vmem [thread:$0]  (!%p2962_p10), %s3690_s0, 192, %s2954_s27, [#allocation4], %s2787_s25, %s2787_s25, %s2788_s23  }
  0x57   : > { %s2563_s29 = scalar_lea.hbm %s2969_s10, 32768  ;;  %p3727_p7 = scmp.ne.s32.totalorder %s3719_s17, 0 }
  0x58   : > { %p2564_p3 = scmp.ne.s32.totalorder %s2969_s10, %s2563_s29  ;;  %s2568_s18 = scalar_lea.hbm %s3692_s2, 65536 }
  0x59   : > { %p2569_p8 = scmp.lt.u32.totalorder %s2969_s10, %s3692_s2  ;;  %p2570_p5 = scmp.lt.u32.totalorder %s2568_s18, %s2563_s29 }
  0x5a   : > { %p2566_p1 = pnand %p2564_p3, %p3727_p7  ;;  %p2572_p0 = scmp.lt.u32.totalorder %s2563_s29, %s2969_s10 }
  0x5b   : > { %p2571_p11 = por %p2570_p5, %p2569_p8 }
  0x5c   : > { %p2567_p6 = pneg %p2566_p1 }
  0x5d   : > { %p2573_p13 = por %p2572_p0, %p2571_p11 }
  0x5f   : > { %p2574_p2 = pnand %p2573_p13, %p2567_p6 }
  0x61   : > { %2577 = shalt.err (!%p2574_p2)
}
  0x62   : > { %s2578_s27 = scalar_lea.vmem %s2971_s1, 32768  ;;  %s2789_s8 = smov [#allocation8]  }
  0x63   : > { %p2579_p10 = scmp.ne.s32.totalorder %s2971_s1, %s2578_s27  ;;  %s2583_s25 = sshll.u32 %s2789_s8, 4  ;;  %s2584_s25 = int_to_ptr.vmem [resolvable:$false] %s2583_s25 }
  0x64   : > { %s2585_s23 = scalar_lea.vmem %s2584_s25, 65536  ;;  %p2586_p12 = scmp.lt.s32.totalorder %s2971_s1, %s2584_s25 }
  0x65   : > { %p2581_p4 = pnand %p2579_p10, %p3727_p7  ;;  %p2587_p3 = scmp.lt.s32.totalorder %s2585_s23, %s2578_s27 }
  0x67   : > { %p2582_p9 = pneg %p2581_p4  ;;  %p2588_p1 = por %p2587_p3, %p2586_p12 }
  0x69   : > { %p2589_p8 = pnand %p2588_p1, %p2582_p9 }
  0x6b   : > { %2592 = shalt.err (!%p2589_p8)
}
  0x6c   : > { %p3728_p6 = scmp.ne.s32.totalorder %s3718_s14, 0  ;;  %s3729_s28 = smov 64  }
  0x6d   : > { %s3730_s13 = smov 1024   ;;  %s1959_s29 = sshll.u32 %s2873_s30, 3 }
  0x6e   : > { %2405 = dma.hbm_to_vmem [thread:$0]  (!%p3728_p6), %s2969_s10, 32768, %s2971_s1, %s2888_s15, %s3730_s13, %s3730_s13, %s3729_s28  }
  0x6f   : > { %s1988_s7 = sshll.u32 %s2769_s24, 7  ;;  %s284_s12 = scalar_lea.vmem [#allocation9], %s1959_s29 }
  0x70   : > { %s3024_s9 = scalar_lea.hbm %s3693_s3, %s1988_s7  ;;  %s292_s27 = sshll.u32 %s284_s12, 4  ;;  %s293_s27 = int_to_ptr.vmem [resolvable:$true] %s292_s27 }
  0x71   : > { %s281_s8 = scalar_lea.sflag [#allocation10], %s2873_s30  ;;  %s2593_s25 = scalar_lea.hbm %s3024_s9, 128 }
  0x72   : > { %p2594_p5 = scmp.ne.s32.totalorder %s3024_s9, %s2593_s25  ;;  %s2598_s10 = scalar_lea.hbm %s3693_s3, 256 }
  0x73   : > { %p2599_p13 = scmp.lt.u32.totalorder %s3024_s9, %s3693_s3  ;;  %p2600_p2 = scmp.lt.u32.totalorder %s2598_s10, %s2593_s25 }
  0x74   : > { %p2596_p11 = pnand %p2594_p5, %p3727_p7  ;;  %p2602_p4 = scmp.lt.u32.totalorder %s2593_s25, %s3024_s9 }
  0x75   : > { %p2601_p10 = por %p2600_p2, %p2599_p13 }
  0x76   : > { %p2597_p0 = pneg %p2596_p11 }
  0x77   : > { %p2603_p9 = por %p2602_p4, %p2601_p10 }
  0x79   : > { %p2604_p12 = pnand %p2603_p9, %p2597_p0 }
  0x7b   : > { %2607 = shalt.err (!%p2604_p12)
}
  0x7c   : > { %s2608_s30 = scalar_lea.vmem %s293_s27, 128  ;;  %s2790_s13 = smov [#allocation9]  }
  0x7d   : > { %p2609_p3 = scmp.ne.s32.totalorder %s293_s27, %s2608_s30  ;;  %s2613_s29 = sshll.u32 %s2790_s13, 4  ;;  %s2614_s29 = int_to_ptr.vmem [resolvable:$false] %s2613_s29 }
  0x7e   : > { %s2615_s7 = scalar_lea.vmem %s2614_s29, 256  ;;  %p2616_p5 = scmp.lt.s32.totalorder %s293_s27, %s2614_s29 }
  0x7f   : > { %p2611_p1 = pnand %p2609_p3, %p3727_p7  ;;  %p2617_p11 = scmp.lt.s32.totalorder %s2615_s7, %s2608_s30 }
  0x81   : > { %p2612_p8 = pneg %p2611_p1  ;;  %p2618_p6 = por %p2617_p11, %p2616_p5 }
  0x83   : > { %p2619_p2 = pnand %p2618_p6, %p2612_p8 }
  0x85   : > { %2622 = shalt.err (!%p2619_p2)
}
  0x86   : > { %p3731_p13 = scmp.ne.s32.totalorder %s3718_s14, 0  ;;  %p3732_p0 = scmp.ne.s32.totalorder %s3725_s20, 0 }
  0x87   : > { %p3733_p10 = scmp.eq.s32.totalorder (!%p3732_p0), %s2922_s16, 0 }
  0x88   : > { %2408 = dma.hbm_to_vmem [thread:$0]  (!%p3731_p13), %s3024_s9, 128, %s293_s27, %s281_s8  }
  0x89   : > { %301 = sbr.rel (%p3732_p0) target bundleno = 896 (0x380), region = 36 }
  0x90   : > { %2736 = dma.done.wait (%p3733_p10), [#allocation4], 192   ;;  %p3734_p7 = pmov %p3733_p10 }
  0x91   : > { %s307_s17 = sand.u32 1, %s2922_s16   ;;  %s3052_s26 = sand.u32 1, %s2761_s22  }
  0x92   : > { %2738 = vsyncadd (%p3734_p7), [#allocation4], 4294967104  ;;  %s1964_s14 = sshll.u32 %s3052_s26, 10  ;;  %s308_s18 = scalar_lea.sflag [#allocation7], %s307_s17 }
  0x93   : > { %s3057_s9 = scalar_lea.vmem [#allocation6], %s1964_s14  ;;  %p3735_p6 = scmp.ne.s32.totalorder %s3720_s19, 0 }
  0x95   : > { %2740 = dma.done.wait (%p3735_p6), %s308_s18, 49152  }
  0x96   : > { %2742 = vsyncadd (%p3735_p6), %s308_s18, 4294918144  ;;  %s1965_s20 = sshll.u32 %s3052_s26, 11  ;;  %s1966_s12 = sshll.u32 %s3052_s26, 3 }
  0x97   : > { %s3065_s27 = scalar_lea.vmem [#allocation8], %s1965_s20  ;;  %s326_s8 = scalar_lea.sflag [#allocation10], %s3052_s26 }
  0x98   : > { %s3068_s25 = scalar_lea.vmem [#allocation9], %s1966_s12 }
  0x99   : > { %2744 = dma.done.wait (%p3735_p6), %s326_s8, 128  }
  0x9a   : > { %2746 = vsyncadd (%p3735_p6), %s326_s8, 4294967168  ;;  %s2378_s1 = smul.u32 24, %s3052_s26  ;;  %s1967_s15 = sshll.u32 %s3052_s26, 2  ;;  %v2791_v0 = vmov 0.0   ;;  %v386_v1 = vld [vmem:[%s3057_s9 + $0x8] sm:$0xff]  ;;  %v388_v3 = vld [vmem:[%s3057_s9 + $0x18] sm:$0xff]  ;;  %v515_v63 = vlaneseq }
  0x9b   : > { %652 = vmatprep.mubr.f32.mxu0 %v2791_v0  ;;  %729 = vmatprep.mubr.f32.mxu1 %v2791_v0  ;;  %v394_v2 = vld [vmem:[%s3057_s9 + $0x48] sm:$0xff]  ;;  %v396_v5 = vld [vmem:[%s3057_s9 + $0x58] sm:$0xff]  ;;  %v385_v6 = vld [vmem:[%s3057_s9] sm:$0xff]  ;;  %s3259_s10 = scalar_lea.vmem [#allocation12], %s1967_s15  ;;  %s3263_s23 = scalar_lea.vmem [#allocation14], %s1967_s15 }
  0x9c   : > { %v1994_v4 = vpack.c.bf16 %v394_v2, %v386_v1  ;;  %v393_v7 = vld [vmem:[%s3057_s9 + $0x40] sm:$0xff]  ;;  %v2026_v8 = vpack.c.bf16 %v396_v5, %v388_v3  ;;  %v387_v10 = vld [vmem:[%s3057_s9 + $0x10] sm:$0xff]  ;;  %v402_v12 = vld [vmem:[%s3057_s9 + $0x88] sm:$0xff]  ;;  %v2792_v1 = vmov 1983009808   ;;  %s3255_s19 = scalar_lea.vmem [#allocation11], %s2378_s1 }
  0x9d   : > { %v1996_v9 = vpack.c.bf16 %v393_v7, %v385_v6  ;;  %v395_v11 = vld [vmem:[%s3057_s9 + $0x50] sm:$0xff]  ;;  %v410_v14 = vld [vmem:[%s3057_s9 + $0xc8] sm:$0xff]  ;;  %v404_v15 = vld [vmem:[%s3057_s9 + $0x98] sm:$0xff]  ;;  %v564_v2 = vunpack.c.l.s4 %v2792_v1  ;;  %s3269_s28 = smov 0  }
  0x9e   : > { %1995 = vmatprep.subr.bf16.mxu0 %v1994_v4  ;;  %v2028_v13 = vpack.c.bf16 %v395_v11, %v387_v10  ;;  %v412_v16 = vld [vmem:[%s3057_s9 + $0xd8] sm:$0xff]  ;;  %2027 = vmatprep.subr.bf16.mxu1 %v2026_v8  ;;  %v1998_v17 = vpack.c.bf16 %v410_v14, %v402_v12  ;;  %v401_v19 = vld [vmem:[%s3057_s9 + $0x80] sm:$0xff]  ;;  %v403_v21 = vld [vmem:[%s3057_s9 + $0x90] sm:$0xff] }
  0x9f   : > { %1997 = vmatpush1.bf16.msra.mxu0 %v1996_v9  ;;  %v2030_v18 = vpack.c.bf16 %v412_v16, %v404_v15  ;;  %v409_v20 = vld [vmem:[%s3057_s9 + $0xc0] sm:$0xff]  ;;  %v411_v23 = vld [vmem:[%s3057_s9 + $0xd0] sm:$0xff]  ;;  %v418_v24 = vld [vmem:[%s3057_s9 + $0x108] sm:$0xff]  ;;  %v3131_v16 = vshrl.u32 %v515_v63, 7 }
  0xa0   : > { %2029 = vmatpush1.bf16.msra.mxu1 %v2028_v13  ;;  %v2000_v22 = vpack.c.bf16 %v409_v20, %v401_v19  ;;  %v426_v25 = vld [vmem:[%s3057_s9 + $0x148] sm:$0xff]  ;;  %1999 = vmatprep.subr.bf16.mxu0 %v1998_v17  ;;  %v2032_v26 = vpack.c.bf16 %v411_v23, %v403_v21  ;;  %v420_v28 = vld [vmem:[%s3057_s9 + $0x118] sm:$0xff]  ;;  %v417_v30 = vld [vmem:[%s3057_s9 + $0x100] sm:$0xff]  ;;  %v565_v17 = vunpack.c.0.s8 %v564_v2 }
  0xa1   : > { %2031 = vmatprep.subr.bf16.mxu1 %v2030_v18  ;;  %v2002_v27 = vpack.c.bf16 %v426_v25, %v418_v24  ;;  %v428_v29 = vld [vmem:[%s3057_s9 + $0x158] sm:$0xff]  ;;  %v425_v32 = vld [vmem:[%s3057_s9 + $0x140] sm:$0xff]  ;;  %v419_v33 = vld [vmem:[%s3057_s9 + $0x110] sm:$0xff] }
  0xa2   : > { %v2034_v31 = vpack.c.bf16 %v428_v29, %v420_v28  ;;  %v427_v34 = vld [vmem:[%s3057_s9 + $0x150] sm:$0xff]  ;;  %v2004_v35 = vpack.c.bf16 %v425_v32, %v417_v30  ;;  %v434_v36 = vld [vmem:[%s3057_s9 + $0x188] sm:$0xff]  ;;  %v436_v38 = vld [vmem:[%s3057_s9 + $0x198] sm:$0xff] }
  0xa3   : > { %2001 = vmatpush1.bf16.msra.mxu0 %v2000_v22  ;;  %v442_v37 = vld [vmem:[%s3057_s9 + $0x1c8] sm:$0xff]  ;;  %v2036_v39 = vpack.c.bf16 %v427_v34, %v419_v33  ;;  %v444_v41 = vld [vmem:[%s3057_s9 + $0x1d8] sm:$0xff]  ;;  %v433_v42 = vld [vmem:[%s3057_s9 + $0x180] sm:$0xff] }
  0xa4   : > { %2033 = vmatpush1.bf16.msra.mxu1 %v2032_v26  ;;  %2003 = vmatprep.subr.bf16.mxu0 %v2002_v27  ;;  %v2006_v40 = vpack.c.bf16 %v442_v37, %v434_v36  ;;  %v441_v43 = vld [vmem:[%s3057_s9 + $0x1c0] sm:$0xff]  ;;  %v2038_v44 = vpack.c.bf16 %v444_v41, %v436_v38  ;;  %v435_v45 = vld [vmem:[%s3057_s9 + $0x190] sm:$0xff]  ;;  %v450_v47 = vld [vmem:[%s3057_s9 + $0x208] sm:$0xff] }
  0xa5   : > { %2035 = vmatprep.subr.bf16.mxu1 %v2034_v31  ;;  %v443_v46 = vld [vmem:[%s3057_s9 + $0x1d0] sm:$0xff]  ;;  %v458_v48 = vld [vmem:[%s3057_s9 + $0x248] sm:$0xff]  ;;  %v452_v49 = vld [vmem:[%s3057_s9 + $0x218] sm:$0xff]  ;;  %v2008_v51 = vpack.c.bf16 %v441_v43, %v433_v42 }
  0xa6   : > { %v460_v50 = vld [vmem:[%s3057_s9 + $0x258] sm:$0xff]  ;;  %v2040_v52 = vpack.c.bf16 %v443_v46, %v435_v45  ;;  %v2010_v53 = vpack.c.bf16 %v458_v48, %v450_v47  ;;  %v449_v54 = vld [vmem:[%s3057_s9 + $0x200] sm:$0xff]  ;;  %v451_v56 = vld [vmem:[%s3057_s9 + $0x210] sm:$0xff] }
  0xa7   : > { %2005 = vmatpush1.bf16.msra.mxu0 %v2004_v35  ;;  %v457_v55 = vld [vmem:[%s3057_s9 + $0x240] sm:$0xff]  ;;  %v2042_v57 = vpack.c.bf16 %v460_v50, %v452_v49  ;;  %v459_v58 = vld [vmem:[%s3057_s9 + $0x250] sm:$0xff]  ;;  %v466_v59 = vld [vmem:[%s3057_s9 + $0x288] sm:$0xff]  ;;  %v3141_v35 = vsub.s32 %v565_v17, %v3131_v16 }
  0xa8   : > { %2037 = vmatpush1.bf16.msra.mxu1 %v2036_v39  ;;  %2007 = vmatprep.subr.bf16.mxu0 %v2006_v40  ;;  %v474_v60 = vld [vmem:[%s3057_s9 + $0x2c8] sm:$0xff]  ;;  %v468_v61 = vld [vmem:[%s3057_s9 + $0x298] sm:$0xff]  ;;  %v2012_v3 = vpack.c.bf16 %v457_v55, %v449_v54  ;;  %v2044_v4 = vpack.c.bf16 %v459_v58, %v451_v56  ;;  %v465_v6 = vld [vmem:[%s3057_s9 + $0x280] sm:$0xff] }
  0xa9   : > { %2039 = vmatprep.subr.bf16.mxu1 %v2038_v44  ;;  %v476_v62 = vld [vmem:[%s3057_s9 + $0x2d8] sm:$0xff]  ;;  %v2014_v5 = vpack.c.bf16 %v474_v60, %v466_v59  ;;  %v473_v7 = vld [vmem:[%s3057_s9 + $0x2c0] sm:$0xff]  ;;  %v467_v8 = vld [vmem:[%s3057_s9 + $0x290] sm:$0xff] }
  0xaa   : > { %v2046_v9 = vpack.c.bf16 %v476_v62, %v468_v61  ;;  %v475_v10 = vld [vmem:[%s3057_s9 + $0x2d0] sm:$0xff]  ;;  %v482_v11 = vld [vmem:[%s3057_s9 + $0x308] sm:$0xff]  ;;  %v484_v13 = vld [vmem:[%s3057_s9 + $0x318] sm:$0xff]  ;;  %v2016_v18 = vpack.c.bf16 %v473_v7, %v465_v6 }
  0xab   : > { %2009 = vmatpush1.bf16.msra.mxu0 %v2008_v51  ;;  %v490_v12 = vld [vmem:[%s3057_s9 + $0x348] sm:$0xff]  ;;  %v492_v14 = vld [vmem:[%s3057_s9 + $0x358] sm:$0xff]  ;;  %v481_v15 = vld [vmem:[%s3057_s9 + $0x300] sm:$0xff]  ;;  %v2048_v22 = vpack.c.bf16 %v475_v10, %v467_v8 }
  0xac   : > { %2041 = vmatpush1.bf16.msra.mxu1 %v2040_v52  ;;  %2011 = vmatprep.subr.bf16.mxu0 %v2010_v53  ;;  %v489_v19 = vld [vmem:[%s3057_s9 + $0x340] sm:$0xff]  ;;  %v483_v20 = vld [vmem:[%s3057_s9 + $0x310] sm:$0xff]  ;;  %v2018_v23 = vpack.c.bf16 %v490_v12, %v482_v11  ;;  %v498_v24 = vld [vmem:[%s3057_s9 + $0x388] sm:$0xff]  ;;  %v2050_v27 = vpack.c.bf16 %v492_v14, %v484_v13 }
  0xad   : > { %2043 = vmatprep.subr.bf16.mxu1 %v2042_v57  ;;  %v491_v21 = vld [vmem:[%s3057_s9 + $0x350] sm:$0xff]  ;;  %v506_v28 = vld [vmem:[%s3057_s9 + $0x3c8] sm:$0xff]  ;;  %v381_v29 = vld [vmem:[#allocation3 + $0x4] sm:$0x3]  ;;  %v2020_v36 = vpack.c.bf16 %v489_v19, %v481_v15 }
  0xae   : > { %v379_v25 = vld [vmem:[#allocation3] sm:$0x3]  ;;  %v380_v26 = vld [vmem:[#allocation3 + $0x2] sm:$0x3]  ;;  %v382_v30 = vld [vmem:[#allocation3 + $0x6] sm:$0x3]  ;;  %v2052_v37 = vpack.c.bf16 %v491_v21, %v483_v20  ;;  %v2022_v38 = vpack.c.bf16 %v506_v28, %v498_v24 }
  0xaf   : > { %2013 = vmatpush1.bf16.msra.mxu0 %v2012_v3  ;;  %v500_v31 = vld [vmem:[%s3057_s9 + $0x398] sm:$0xff]  ;;  %v561_v33 = vcombine.low %v379_v25, %v380_v26  ;;  %v562_v34 = vcombine.low %v381_v29, %v382_v30  ;;  %v497_v39 = vld [vmem:[%s3057_s9 + $0x380] sm:$0xff]  ;;  %v499_v41 = vld [vmem:[%s3057_s9 + $0x390] sm:$0xff] }
  0xb0   : > { %2045 = vmatpush1.bf16.msra.mxu1 %v2044_v4  ;;  %2015 = vmatprep.subr.bf16.mxu0 %v2014_v5  ;;  %v508_v32 = vld [vmem:[%s3057_s9 + $0x3d8] sm:$0xff]  ;;  %v505_v40 = vld [vmem:[%s3057_s9 + $0x3c0] sm:$0xff]  ;;  %v507_v43 = vld [vmem:[%s3057_s9 + $0x3d0] sm:$0xff] }
  0xb1   : > { %2047 = vmatprep.subr.bf16.mxu1 %v2046_v9  ;;  %v2054_v42 = vpack.c.bf16 %v508_v32, %v500_v31  ;;  %v390_v44 = vld [vmem:[%s3057_s9 + $0x28] sm:$0xff]  ;;  %v569_v46 = vrot.slane %v561_v33, %v3141_v35  ;;  %v576_v47 = vrot.slane %v562_v34, %v3141_v35  ;;  %v392_v48 = vld [vmem:[%s3057_s9 + $0x38] sm:$0xff]  ;;  %v2024_v50 = vpack.c.bf16 %v505_v40, %v497_v39  ;;  %v389_v53 = vld [vmem:[%s3057_s9 + $0x20] sm:$0xff] }
  0xb2   : > { %v398_v45 = vld [vmem:[%s3057_s9 + $0x68] sm:$0xff]  ;;  %v400_v49 = vld [vmem:[%s3057_s9 + $0x78] sm:$0xff]  ;;  %v2056_v51 = vpack.c.bf16 %v507_v43, %v499_v41  ;;  %v397_v54 = vld [vmem:[%s3057_s9 + $0x60] sm:$0xff] }
  0xb3   : > { %2017 = vmatpush1.bf16.msra.mxu0 %v2016_v18  ;;  %v2058_v52 = vpack.c.bf16 %v398_v45, %v390_v44  ;;  %v391_v55 = vld [vmem:[%s3057_s9 + $0x30] sm:$0xff]  ;;  %v2090_v56 = vpack.c.bf16 %v400_v49, %v392_v48  ;;  %v406_v58 = vld [vmem:[%s3057_s9 + $0xa8] sm:$0xff]  ;;  %v3159_v60 = vcombine.low %v569_v46, %v576_v47  ;;  %v408_v61 = vld [vmem:[%s3057_s9 + $0xb8] sm:$0xff]  ;;  %v2060_v63 = vpack.c.bf16 %v397_v54, %v389_v53 }
  0xb4   : > { %2049 = vmatpush1.bf16.msra.mxu1 %v2048_v22  ;;  %2019 = vmatprep.subr.bf16.mxu0 %v2018_v23  ;;  %v399_v57 = vld [vmem:[%s3057_s9 + $0x70] sm:$0xff]  ;;  %v414_v59 = vld [vmem:[%s3057_s9 + $0xe8] sm:$0xff]  ;;  %v416_v62 = vld [vmem:[%s3057_s9 + $0xf8] sm:$0xff] }
  0xb5   : > { %2051 = vmatprep.subr.bf16.mxu1 %v2050_v27  ;;  %v2092_v1 = vpack.c.bf16 %v399_v57, %v391_v55  ;;  %v2062_v2 = vpack.c.bf16 %v414_v59, %v406_v58  ;;  %v405_v3 = vld [vmem:[%s3057_s9 + $0xa0] sm:$0xff]  ;;  %v407_v5 = vld [vmem:[%s3057_s9 + $0xb0] sm:$0xff]  ;;  %v2094_v6 = vpack.c.bf16 %v416_v62, %v408_v61  ;;  %v422_v8 = vld [vmem:[%s3057_s9 + $0x128] sm:$0xff] }
  0xb6   : > { %v413_v4 = vld [vmem:[%s3057_s9 + $0xe0] sm:$0xff]  ;;  %v415_v7 = vld [vmem:[%s3057_s9 + $0xf0] sm:$0xff]  ;;  %v430_v9 = vld [vmem:[%s3057_s9 + $0x168] sm:$0xff] }
  0xb7   : > { %2021 = vmatpush1.bf16.msra.mxu0 %v2020_v36  ;;  %v424_v10 = vld [vmem:[%s3057_s9 + $0x138] sm:$0xff]  ;;  %v2064_v12 = vpack.c.bf16 %v413_v4, %v405_v3  ;;  %v2096_v13 = vpack.c.bf16 %v415_v7, %v407_v5  ;;  %v2066_v14 = vpack.c.bf16 %v430_v9, %v422_v8  ;;  %v421_v15 = vld [vmem:[%s3057_s9 + $0x120] sm:$0xff]  ;;  %v423_v18 = vld [vmem:[%s3057_s9 + $0x130] sm:$0xff] }
  0xb8   : > { %2053 = vmatpush1.bf16.msra.mxu1 %v2052_v37  ;;  %2023 = vmatprep.subr.bf16.mxu0 %v2022_v38  ;;  %v432_v11 = vld [vmem:[%s3057_s9 + $0x178] sm:$0xff]  ;;  %v429_v17 = vld [vmem:[%s3057_s9 + $0x160] sm:$0xff]  ;;  %v431_v20 = vld [vmem:[%s3057_s9 + $0x170] sm:$0xff] }
  0xb9   : > { %2055 = vmatprep.subr.bf16.mxu1 %v2054_v42  ;;  %v2098_v19 = vpack.c.bf16 %v432_v11, %v424_v10  ;;  %v438_v21 = vld [vmem:[%s3057_s9 + $0x1a8] sm:$0xff]  ;;  %v440_v23 = vld [vmem:[%s3057_s9 + $0x1b8] sm:$0xff]  ;;  %v2068_v25 = vpack.c.bf16 %v429_v17, %v421_v15  ;;  %v437_v26 = vld [vmem:[%s3057_s9 + $0x1a0] sm:$0xff]  ;;  %v2100_v28 = vpack.c.bf16 %v431_v20, %v423_v18 }
  0xba   : > { %v446_v22 = vld [vmem:[%s3057_s9 + $0x1e8] sm:$0xff]  ;;  %v448_v24 = vld [vmem:[%s3057_s9 + $0x1f8] sm:$0xff]  ;;  %v445_v27 = vld [vmem:[%s3057_s9 + $0x1e0] sm:$0xff] }
  0xbb   : > { %2025 = vmatpush1.bf16.msra.mxu0 %v2024_v50  ;;  %v2070_v29 = vpack.c.bf16 %v446_v22, %v438_v21  ;;  %v439_v30 = vld [vmem:[%s3057_s9 + $0x1b0] sm:$0xff]  ;;  %v383_v31 = vld [vmem:[#allocation3 + $0x8] sm:$0x3]  ;;  %v384_v32 = vld [vmem:[#allocation3 + $0xa] sm:$0x3]  ;;  %v2102_v33 = vpack.c.bf16 %v448_v24, %v440_v23  ;;  %v2072_v41 = vpack.c.bf16 %v445_v27, %v437_v26  ;;  %v517_v27 = vsub.s32 0, %v3131_v16 }
  0xbc   : > { %2057 = vmatpush1.bf16.msra.mxu1 %v2056_v51  ;;  %2059 = vmatprep.subr.bf16.mxu0 %v2058_v52  ;;  %v447_v34 = vld [vmem:[%s3057_s9 + $0x1f0] sm:$0xff]  ;;  %v454_v36 = vld [vmem:[%s3057_s9 + $0x228] sm:$0xff]  ;;  %v578_v38 = vcombine.low %v383_v31, %v384_v32  ;;  %v456_v39 = vld [vmem:[%s3057_s9 + $0x238] sm:$0xff]  ;;  %v529_v31 = vsub.s32 3, %v3131_v16 }
  0xbd   : > { %2091 = vmatprep.subr.bf16.mxu1 %v2090_v56  ;;  %v462_v37 = vld [vmem:[%s3057_s9 + $0x268] sm:$0xff]  ;;  %v464_v40 = vld [vmem:[%s3057_s9 + $0x278] sm:$0xff]  ;;  %v2104_v43 = vpack.c.bf16 %v447_v34, %v439_v30  ;;  %v453_v45 = vld [vmem:[%s3057_s9 + $0x220] sm:$0xff]  ;;  %v521_v30 = vsub.s32 1, %v3131_v16 }
  0xbe   : > { %653 = vmatmul.mubr.f32.vlgmr.msra.gmra.mrb[0].mxu0 %v3159_v60  ;;  %v3192_v42 = vrot.slane %v578_v38, %v3141_v35  ;;  %v2074_v44 = vpack.c.bf16 %v462_v37, %v454_v36  ;;  %v461_v46 = vld [vmem:[%s3057_s9 + $0x260] sm:$0xff]  ;;  %v455_v47 = vld [vmem:[%s3057_s9 + $0x230] sm:$0xff]  ;;  %v2106_v48 = vpack.c.bf16 %v464_v40, %v456_v39  ;;  %v470_v50 = vld [vmem:[%s3057_s9 + $0x2a8] sm:$0xff] }
  0xbf   : > { %730 = vmatmul.mubr.f32.vlgmr.msra.gmra.mrb[0].mxu1 %v3159_v60  ;;  %2061 = vmatpush1.bf16.msra.mxu0 %v2060_v63  ;;  %v463_v49 = vld [vmem:[%s3057_s9 + $0x270] sm:$0xff]  ;;  %v478_v51 = vld [vmem:[%s3057_s9 + $0x2e8] sm:$0xff]  ;;  %v472_v52 = vld [vmem:[%s3057_s9 + $0x2b8] sm:$0xff]  ;;  %v2076_v54 = vpack.c.bf16 %v461_v46, %v453_v45 }
  0xc0   : > { %2093 = vmatpush1.bf16.msra.mxu1 %v2092_v1  ;;  %2063 = vmatprep.subr.bf16.mxu0 %v2062_v2  ;;  %v480_v53 = vld [vmem:[%s3057_s9 + $0x2f8] sm:$0xff]  ;;  %v2108_v55 = vpack.c.bf16 %v463_v49, %v455_v47  ;;  %v2078_v56 = vpack.c.bf16 %v478_v51, %v470_v50  ;;  %v469_v57 = vld [vmem:[%s3057_s9 + $0x2a0] sm:$0xff]  ;;  %v471_v59 = vld [vmem:[%s3057_s9 + $0x2b0] sm:$0xff] }
  0xc1   : > { %2095 = vmatprep.subr.bf16.mxu1 %v2094_v6  ;;  %658 = vmatprep.mubr.f32.mxu0 %v2791_v0  ;;  %v477_v58 = vld [vmem:[%s3057_s9 + $0x2e0] sm:$0xff]  ;;  %v2110_v61 = vpack.c.bf16 %v480_v53, %v472_v52  ;;  %v479_v62 = vld [vmem:[%s3057_s9 + $0x2f0] sm:$0xff]  ;;  %v486_v63 = vld [vmem:[%s3057_s9 + $0x328] sm:$0xff] }
  0xc2   : > { %735 = vmatprep.mubr.f32.mxu1 %v2791_v0  ;;  %659 = vmatmul.mubr.f32.gmra.mrb[2].mxu0 %v3192_v42  ;;  %v494_v1 = vld [vmem:[%s3057_s9 + $0x368] sm:$0xff]  ;;  %v488_v2 = vld [vmem:[%s3057_s9 + $0x338] sm:$0xff]  ;;  %v2080_v4 = vpack.c.bf16 %v477_v58, %v469_v57  ;;  %v2112_v5 = vpack.c.bf16 %v479_v62, %v471_v59  ;;  %v485_v7 = vld [vmem:[%s3057_s9 + $0x320] sm:$0xff] }
  0xc3   : > { %2065 = vmatpush1.bf16.msra.mxu0 %v2064_v12  ;;  %736 = vmatmul.mubr.f32.gmra.mrb[2].mxu1 %v3192_v42  ;;  %v496_v3 = vld [vmem:[%s3057_s9 + $0x378] sm:$0xff]  ;;  %v2082_v6 = vpack.c.bf16 %v494_v1, %v486_v63  ;;  %v493_v8 = vld [vmem:[%s3057_s9 + $0x360] sm:$0xff]  ;;  %v487_v9 = vld [vmem:[%s3057_s9 + $0x330] sm:$0xff] }
  0xc4   : > { %2097 = vmatpush1.bf16.msra.mxu1 %v2096_v13  ;;  %2067 = vmatprep.subr.bf16.mxu0 %v2066_v14  ;;  %v2114_v10 = vpack.c.bf16 %v496_v3, %v488_v2  ;;  %v495_v11 = vld [vmem:[%s3057_s9 + $0x370] sm:$0xff]  ;;  %v502_v12 = vld [vmem:[%s3057_s9 + $0x3a8] sm:$0xff]  ;;  %v504_v14 = vld [vmem:[%s3057_s9 + $0x3b8] sm:$0xff]  ;;  %v2084_v17 = vpack.c.bf16 %v493_v8, %v485_v7  ;;  %v533_v7 = vsub.s32 4, %v3131_v16  ;;  %v541_v8 = vsub.s32 6, %v3131_v16 }
  0xc5   : > { %2099 = vmatprep.subr.bf16.mxu1 %v2098_v19  ;;  %806 = vmatprep.mubr.f32.mxu0 %v2791_v0  ;;  %v510_v13 = vld [vmem:[%s3057_s9 + $0x3e8] sm:$0xff]  ;;  %v512_v15 = vld [vmem:[%s3057_s9 + $0x3f8] sm:$0xff]  ;;  %v2116_v18 = vpack.c.bf16 %v495_v11, %v487_v9  ;;  %v501_v20 = vld [vmem:[%s3057_s9 + $0x3a0] sm:$0xff]  ;;  %v537_v9 = vsub.s32 5, %v3131_v16 }
  0xc6   : > { %883 = vmatprep.mubr.f32.mxu1 %v2791_v0  ;;  %v2086_v19 = vpack.c.bf16 %v510_v13, %v502_v12  ;;  %v509_v21 = vld [vmem:[%s3057_s9 + $0x3e0] sm:$0xff]  ;;  %v2118_v22 = vpack.c.bf16 %v512_v15, %v504_v14  ;;  %v503_v23 = vld [vmem:[%s3057_s9 + $0x3b0] sm:$0xff] }
  0xc7   : > { %2069 = vmatpush1.bf16.msra.mxu0 %v2068_v25  ;;  %v511_v24 = vld [vmem:[%s3057_s9 + $0x3f0] sm:$0xff]  ;;  %v2088_v25 = vpack.c.bf16 %v509_v21, %v501_v20 }
  0xc8   : > { %2101 = vmatpush1.bf16.msra.mxu1 %v2100_v28  ;;  %2071 = vmatprep.subr.bf16.mxu0 %v2070_v29  ;;  %v2120_v26 = vpack.c.bf16 %v511_v24, %v503_v23  ;;  %v513_v28 = vld [vmem:[%s3068_s25] sm:$0xff]  ;;  %v525_v29 = vsub.s32 2, %v3131_v16 }
  0xc9   : > { %2103 = vmatprep.subr.bf16.mxu1 %v2102_v33  ;;  %v518_v32 = vrot.slane %v513_v28, %v517_v27  ;;  %v530_v34 = vrot.slane %v513_v28, %v529_v31  ;;  %v534_v11 = vrot.slane %v513_v28, %v533_v7  ;;  %v542_v12 = vrot.slane %v513_v28, %v541_v8 }
  0xca   : > { %v526_v33 = vrot.slane %v513_v28, %v525_v29  ;;  %v538_v13 = vrot.slane %v513_v28, %v537_v9 }
  0xcb   : > { %2073 = vmatpush1.bf16.msra.mxu0 %v2072_v41 }
  0xcc   : > { %2105 = vmatpush1.bf16.msra.mxu1 %v2104_v43  ;;  %2075 = vmatprep.subr.bf16.mxu0 %v2074_v44 }
  0xcd   : > { %2107 = vmatprep.subr.bf16.mxu1 %v2106_v48 }
  0xcf   : > { %2077 = vmatpush1.bf16.msra.mxu0 %v2076_v54 }
  0xd0   : > { %2109 = vmatpush1.bf16.msra.mxu1 %v2108_v55  ;;  %2079 = vmatprep.subr.bf16.mxu0 %v2078_v56 }
  0xd1   : > { %2111 = vmatprep.subr.bf16.mxu1 %v2110_v61 }
  0xd3   : > { %2081 = vmatpush1.bf16.msra.mxu0 %v2080_v4 }
  0xd4   : > { %2113 = vmatpush1.bf16.msra.mxu1 %v2112_v5  ;;  %2083 = vmatprep.subr.bf16.mxu0 %v2082_v6 }
  0xd5   : > { %2115 = vmatprep.subr.bf16.mxu1 %v2114_v10  ;;  %v545_v10 = vsub.s32 7, %v3131_v16 }
  0xd7   : > { %2085 = vmatpush1.bf16.msra.mxu0 %v2084_v17  ;;  %v546_v14 = vrot.slane %v513_v28, %v545_v10 }
  0xd8   : > { %2117 = vmatpush1.bf16.msra.mxu1 %v2116_v18  ;;  %2087 = vmatprep.subr.bf16.mxu0 %v2086_v19 }
  0xd9   : > { %2119 = vmatprep.subr.bf16.mxu1 %v2118_v22 }
  0xdb   : > { %2089 = vmatpush1.bf16.msra.mxu0 %v2088_v25 }
  0xdc   : > { %2121 = vmatpush1.bf16.msra.mxu1 %v2120_v26 }
  0xde   : > { %807 = vmatmul.mubr.f32.vlgmr.msra.gmra.mrb[4].mxu0 %v3159_v60 }
  0xdf   : > { %884 = vmatmul.mubr.f32.vlgmr.msra.gmra.mrb[4].mxu1 %v3159_v60  ;;  %812 = vmatprep.mubr.f32.mxu0 %v2791_v0  ;;  %v522_v60 = vrot.slane %v513_v28, %v521_v30 }
  0xe0   : > { %889 = vmatprep.mubr.f32.mxu1 %v2791_v0 }
  0xe2   : > { %813 = vmatmul.mubr.f32.gmra.mrb[6].mxu0 %v3192_v42 }
  0xe3   : > { %890 = vmatmul.mubr.f32.gmra.mrb[6].mxu1 %v3192_v42 }
 0x191   : > { %v654_v36 = vpop.f32.mrb[0].mxu0 }
 0x192   : > { %v655_v37 = vadd.f32 %v654_v36, %v518_v32  ;;  %v731_v0 = vpop.f32.mrb[0].mxu1  ;;  %v656_v38 = vpop.f32.mrb[1].mxu0 }
 0x193   : > { %v732_v39 = vadd.f32 %v731_v0, %v526_v33  ;;  %v657_v40 = vadd.f32 %v656_v38, %v522_v60  ;;  %v733_v41 = vpop.f32.mrb[1].mxu1 }
 0x194   : > { %v734_v42 = vadd.f32 %v733_v41, %v530_v34 }
 0x195   : > { %v912_v43 = vcombine.low %v655_v37, %v657_v40  ;;  %v913_v44 = vcombine.high %v655_v37, %v657_v40  ;;  %v660_v55 = vpop.f32.mrb[2].mxu0 }
 0x196   : > { %v914_v45 = vcombine.low %v732_v39, %v734_v42  ;;  %v915_v46 = vcombine.high %v732_v39, %v734_v42  ;;  %v661_v56 = vadd.f32 %v660_v55, %v518_v32  ;;  %v737_v57 = vpop.f32.mrb[2].mxu1  ;;  %v662_v58 = vpop.f32.mrb[3].mxu0 }
 0x197   : > { %v922_v47 = vrot.slane %v912_v43, %v3141_v35  ;;  %v929_v48 = vrot.slane %v913_v44, %v3141_v35  ;;  %v738_v59 = vadd.f32 %v737_v57, %v526_v33  ;;  %v663_v61 = vadd.f32 %v662_v58, %v522_v60  ;;  %v739_v62 = vpop.f32.mrb[3].mxu1 }
 0x198   : > { %v936_v49 = vrot.slane %v914_v45, %v3141_v35  ;;  %v943_v50 = vrot.slane %v915_v46, %v3141_v35  ;;  %v740_v63 = vadd.f32 %v739_v62, %v530_v34 }
 0x199   : > { %v984_v1 = vcombine.low %v661_v56, %v663_v61 }
 0x19a   : > { %v944_v51 = vcombine.low %v922_v47, %v936_v49  ;;  %v945_v52 = vcombine.high %v922_v47, %v936_v49  ;;  %v946_v53 = vcombine.low %v929_v48, %v943_v50  ;;  %v947_v54 = vcombine.high %v929_v48, %v943_v50 }
 0x19b   : > { %v985_v2 = vcombine.low %v738_v59, %v740_v63  ;;  %v992_v3 = vrot.slane %v984_v1, %v3141_v35  ;;  %v3265_v48 = vmov 0.0   ;;  %v3267_v49 = vmov 0.0  }
 0x19c   : > { %1032 = vst [vmem:[#allocation2] sm:$0xff] %v944_v51  ;;  %1034 = vst [vmem:[#allocation2 + $0x10] sm:$0xff] %v945_v52 }
 0x19d   : > { %1036 = vst [vmem:[#allocation2 + $0x20] sm:$0xff] %v946_v53  ;;  %1038 = vst [vmem:[#allocation2 + $0x30] sm:$0xff] %v947_v54  ;;  %v999_v4 = vrot.slane %v985_v2, %v3141_v35 }
 0x19f   : > { %v1000_v5 = vcombine.low %v992_v3, %v999_v4  ;;  %v1001_v6 = vcombine.high %v992_v3, %v999_v4 }
 0x1a1   : > { %1040 = vst [vmem:[#allocation2 + $0x40] sm:$0xff] %v1000_v5  ;;  %1042 = vst [vmem:[#allocation2 + $0x50] sm:$0xff] %v1001_v6 }
 0x1b1   : > { %v808_v15 = vpop.f32.mrb[4].mxu0 }
 0x1b2   : > { %v809_v17 = vadd.f32 %v808_v15, %v534_v11  ;;  %v885_v18 = vpop.f32.mrb[4].mxu1  ;;  %v810_v19 = vpop.f32.mrb[5].mxu0 }
 0x1b3   : > { %v886_v20 = vadd.f32 %v885_v18, %v542_v12  ;;  %v811_v21 = vadd.f32 %v810_v19, %v538_v13  ;;  %v887_v22 = vpop.f32.mrb[5].mxu1 }
 0x1b4   : > { %v888_v23 = vadd.f32 %v887_v22, %v546_v14 }
 0x1b5   : > { %v948_v24 = vcombine.low %v809_v17, %v811_v21  ;;  %v949_v25 = vcombine.high %v809_v17, %v811_v21  ;;  %v814_v26 = vpop.f32.mrb[6].mxu0 }
 0x1b6   : > { %v950_v27 = vcombine.low %v886_v20, %v888_v23  ;;  %v951_v29 = vcombine.high %v886_v20, %v888_v23  ;;  %v815_v30 = vadd.f32 %v814_v26, %v534_v11  ;;  %v891_v31 = vpop.f32.mrb[6].mxu1  ;;  %v816_v16 = vpop.f32.mrb[7].mxu0 }
 0x1b7   : > { %v958_v32 = vrot.slane %v948_v24, %v3141_v35  ;;  %v965_v28 = vrot.slane %v949_v25, %v3141_v35  ;;  %v892_v33 = vadd.f32 %v891_v31, %v542_v12  ;;  %v817_v60 = vadd.f32 %v816_v16, %v538_v13  ;;  %v893_v34 = vpop.f32.mrb[7].mxu1 }
 0x1b8   : > { %v972_v36 = vrot.slane %v950_v27, %v3141_v35  ;;  %v979_v37 = vrot.slane %v951_v29, %v3141_v35  ;;  %v894_v0 = vadd.f32 %v893_v34, %v546_v14 }
 0x1b9   : > { %v1002_v38 = vcombine.low %v815_v30, %v817_v60 }
 0x1ba   : > { %v980_v39 = vcombine.low %v958_v32, %v972_v36  ;;  %v981_v40 = vcombine.high %v958_v32, %v972_v36  ;;  %v982_v41 = vcombine.low %v965_v28, %v979_v37  ;;  %v983_v42 = vcombine.high %v965_v28, %v979_v37 }
 0x1bb   : > { %v1010_v43 = vrot.slane %v1002_v38, %v3141_v35  ;;  %v1003_v44 = vcombine.low %v892_v33, %v894_v0 }
 0x1bc   : > { %1033 = vst [vmem:[#allocation2 + $0x8] sm:$0xff] %v980_v39  ;;  %1035 = vst [vmem:[#allocation2 + $0x18] sm:$0xff] %v981_v40 }
 0x1bd   : > { %1037 = vst [vmem:[#allocation2 + $0x28] sm:$0xff] %v982_v41  ;;  %1039 = vst [vmem:[#allocation2 + $0x38] sm:$0xff] %v983_v42  ;;  %v1017_v45 = vrot.slane %v1003_v44, %v3141_v35 }
 0x1bf   : > { %v1018_v46 = vcombine.low %v1010_v43, %v1017_v45  ;;  %v1019_v47 = vcombine.high %v1010_v43, %v1017_v45 }
 0x1c1   : > { %1041 = vst [vmem:[#allocation2 + $0x48] sm:$0xff] %v1018_v46  ;;  %1043 = vst [vmem:[#allocation2 + $0x58] sm:$0xff] %v1019_v47 }
 0x1c2 LB: >> { %v1061_v50 = vld [vmem:[%s3065_s27 + $0x8] sm:$0xff]  ;;  %v1063_v52 = vld [vmem:[%s3065_s27 + $0x18] sm:$0xff]  ;;  %v1060_v55 = vld [vmem:[%s3065_s27] sm:$0xff]  ;;  %v3288_v63 = vrot.slane %v2777_v49, %v3141_v35  ;;  %s1053_s30 = ssub.s32 5, %s2781_s28  ;;  %p3736_p4 = scmp.eq.s32.totalorder %s2922_s16, 0  ;;  %s2781_s28 = sphi %s3269_s28, %s1049_s28   ;;  %v2777_v49 = vphi %v3267_v49, %v3738_v49   ;;  %v2773_v48 = vphi %v3265_v48, %v3737_v48  }
 0x1c3   : >> { %v1069_v51 = vld [vmem:[%s3065_s27 + $0x48] sm:$0xff]  ;;  %v1071_v54 = vld [vmem:[%s3065_s27 + $0x58] sm:$0xff]  ;;  %v1068_v56 = vld [vmem:[%s3065_s27 + $0x40] sm:$0xff] }
 0x1c4   : >> { %v2122_v53 = vpack.c.bf16 %v1069_v51, %v1061_v50  ;;  %v2186_v57 = vpack.c.bf16 %v1071_v54, %v1063_v52  ;;  %v2124_v58 = vpack.c.bf16 %v1068_v56, %v1060_v55  ;;  %v1062_v59 = vld [vmem:[%s3065_s27 + $0x10] sm:$0xff]  ;;  %v1077_v62 = vld [vmem:[%s3065_s27 + $0x88] sm:$0xff]  ;;  %v1079_v3 = vld [vmem:[%s3065_s27 + $0x98] sm:$0xff]  ;;  %v3298_v10 = vcombine.high %v3288_v63, %v3288_v63  ;;  %s3555_s13 = scalar_select %p3736_p4, %s2781_s28, %s1053_s30 }
 0x1c5   : >> { %v1070_v61 = vld [vmem:[%s3065_s27 + $0x50] sm:$0xff]  ;;  %v1085_v2 = vld [vmem:[%s3065_s27 + $0xc8] sm:$0xff]  ;;  %v1087_v4 = vld [vmem:[%s3065_s27 + $0xd8] sm:$0xff]  ;;  %s1049_s28 = sadd.s32 1, %s2781_s28  }
 0x1c6   : >> { %2123 = vmatprep.subr.bf16.mxu0 %v2122_v53  ;;  %v2188_v1 = vpack.c.bf16 %v1070_v61, %v1062_v59  ;;  %2187 = vmatprep.subr.bf16.mxu1 %v2186_v57  ;;  %v2126_v5 = vpack.c.bf16 %v1085_v2, %v1077_v62  ;;  %v2190_v6 = vpack.c.bf16 %v1087_v4, %v1079_v3  ;;  %v1076_v7 = vld [vmem:[%s3065_s27 + $0x80] sm:$0xff]  ;;  %v1078_v9 = vld [vmem:[%s3065_s27 + $0x90] sm:$0xff]  ;;  %v1093_v13 = vld [vmem:[%s3065_s27 + $0x108] sm:$0xff]  ;;  %s1989_s29 = sshll.u32 %s3555_s13, 4  ;;  %s1990_s14 = sshll.u32 %s3555_s13, 2 }
 0x1c7   : >> { %2125 = vmatpush1.bf16.msra.mxu0 %v2124_v58  ;;  %v1084_v8 = vld [vmem:[%s3065_s27 + $0xc0] sm:$0xff]  ;;  %v1086_v12 = vld [vmem:[%s3065_s27 + $0xd0] sm:$0xff]  ;;  %v1101_v14 = vld [vmem:[%s3065_s27 + $0x148] sm:$0xff]  ;;  %1391 = vmatprep.mubr.f32.mxu0 %v3298_v10  ;;  %s1057_s7 = scalar_lea.vmem [#allocation2], %s1989_s29  ;;  %s1689_s18 = scalar_lea.vmem %s3255_s19, %s1990_s14 [#allocation11] }
 0x1c8   : >> { %2189 = vmatpush1.bf16.msra.mxu1 %v2188_v1  ;;  %v2128_v11 = vpack.c.bf16 %v1084_v8, %v1076_v7  ;;  %2127 = vmatprep.subr.bf16.mxu0 %v2126_v5  ;;  %v2192_v15 = vpack.c.bf16 %v1086_v12, %v1078_v9  ;;  %v2130_v17 = vpack.c.bf16 %v1101_v14, %v1093_v13  ;;  %v1095_v18 = vld [vmem:[%s3065_s27 + $0x118] sm:$0xff]  ;;  %v1092_v20 = vld [vmem:[%s3065_s27 + $0x100] sm:$0xff]  ;;  %v1094_v23 = vld [vmem:[%s3065_s27 + $0x110] sm:$0xff]  ;;  %p1046_p9 = scmp.ge.s32.totalorder %s1049_s28, 6  }
 0x1c9   : >> { %2191 = vmatprep.subr.bf16.mxu1 %v2190_v6  ;;  %v1103_v19 = vld [vmem:[%s3065_s27 + $0x158] sm:$0xff]  ;;  %v1100_v22 = vld [vmem:[%s3065_s27 + $0x140] sm:$0xff]  ;;  %v1102_v24 = vld [vmem:[%s3065_s27 + $0x150] sm:$0xff]  ;;  %1462 = vmatprep.mubr.f32.mxu1 %v3298_v10  ;;  %s3573_s9 = sshll.u32 (%p1046_p9), %s2922_s16, 6  ;;  %s1734_s15 = sshll.u32 (%p1046_p9), %s3259_s10, 4  ;;  %s3588_s15 = int_to_ptr.vmem [resolvable:$true] %s1734_s15 }
 0x1ca   : >> { %v2194_v21 = vpack.c.bf16 %v1103_v19, %v1095_v18  ;;  %v2132_v25 = vpack.c.bf16 %v1100_v22, %v1092_v20  ;;  %v1109_v26 = vld [vmem:[%s3065_s27 + $0x188] sm:$0xff]  ;;  %v1111_v29 = vld [vmem:[%s3065_s27 + $0x198] sm:$0xff]  ;;  %v2196_v30 = vpack.c.bf16 %v1102_v24, %v1094_v23  ;;  %v1108_v32 = vld [vmem:[%s3065_s27 + $0x180] sm:$0xff]  ;;  %s3579_s8 = scalar_lea.hbm (%p1046_p9), %s3694_s4, %s3573_s9  ;;  %s1717_s28 = sshll.u32 (%p1046_p9), %s3255_s19, 4  ;;  %s3619_s28 = int_to_ptr.vmem [resolvable:$true] %s1717_s28 }
 0x1cb   : >> { %2129 = vmatpush1.bf16.msra.mxu0 %v2128_v11  ;;  %v1117_v27 = vld [vmem:[%s3065_s27 + $0x1c8] sm:$0xff]  ;;  %v1119_v16 = vld [vmem:[%s3065_s27 + $0x1d8] sm:$0xff]  ;;  %v1116_v28 = vld [vmem:[%s3065_s27 + $0x1c0] sm:$0xff]  ;;  %s3593_s30 = scalar_lea.sflag (%p1046_p9), [#allocation13], %s307_s17  ;;  %s2623_s13 = scalar_lea.vmem (%p1046_p9), %s3588_s15, 64 }
 0x1cc   : >> { %2193 = vmatpush1.bf16.msra.mxu1 %v2192_v15  ;;  %2131 = vmatprep.subr.bf16.mxu0 %v2130_v17  ;;  %v2134_v31 = vpack.c.bf16 %v1117_v27, %v1109_v26  ;;  %v2198_v33 = vpack.c.bf16 %v1119_v16, %v1111_v29  ;;  %v1110_v60 = vld [vmem:[%s3065_s27 + $0x190] sm:$0xff]  ;;  %v1125_v36 = vld [vmem:[%s3065_s27 + $0x208] sm:$0xff]  ;;  %v1127_v0 = vld [vmem:[%s3065_s27 + $0x218] sm:$0xff]  ;;  %v2136_v39 = vpack.c.bf16 %v1116_v28, %v1108_v32  ;;  %p2624_p12 = scmp.ne.s32.totalorder (%p1046_p9), %s3588_s15, %s2623_s13  ;;  %p3739_p3 = scmp.ne.s32.totalorder (%p1046_p9), %s3722_s11, 0 }
 0x1cd   : >> { %2195 = vmatprep.subr.bf16.mxu1 %v2194_v21  ;;  %v1118_v34 = vld [vmem:[%s3065_s27 + $0x1d0] sm:$0xff]  ;;  %v1133_v37 = vld [vmem:[%s3065_s27 + $0x248] sm:$0xff]  ;;  %v1135_v38 = vld [vmem:[%s3065_s27 + $0x258] sm:$0xff]  ;;  %s2793_s29 = smov (%p1046_p9), [#allocation12]  }
 0x1ce   : >> { %v2200_v40 = vpack.c.bf16 %v1118_v34, %v1110_v60  ;;  %v2138_v41 = vpack.c.bf16 %v1133_v37, %v1125_v36  ;;  %v1124_v42 = vld [vmem:[%s3065_s27 + $0x200] sm:$0xff]  ;;  %v1126_v44 = vld [vmem:[%s3065_s27 + $0x210] sm:$0xff]  ;;  %v2202_v45 = vpack.c.bf16 %v1135_v38, %v1127_v0  ;;  %v1141_v47 = vld [vmem:[%s3065_s27 + $0x288] sm:$0xff]  ;;  %p2625_p1 = pnand (%p1046_p9), %p2624_p12, %p3739_p3 }
 0x1cf   : >> { %2133 = vmatpush1.bf16.msra.mxu0 %v2132_v25  ;;  %v1132_v43 = vld [vmem:[%s3065_s27 + $0x240] sm:$0xff]  ;;  %v1134_v46 = vld [vmem:[%s3065_s27 + $0x250] sm:$0xff]  ;;  %v1149_v49 = vld [vmem:[%s3065_s27 + $0x2c8] sm:$0xff] }
 0x1d0   : >> { %2197 = vmatpush1.bf16.msra.mxu1 %v2196_v30  ;;  %2135 = vmatprep.subr.bf16.mxu0 %v2134_v31  ;;  %v1143_v50 = vld [vmem:[%s3065_s27 + $0x298] sm:$0xff]  ;;  %v2140_v52 = vpack.c.bf16 %v1132_v43, %v1124_v42  ;;  %v2204_v53 = vpack.c.bf16 %v1134_v46, %v1126_v44  ;;  %v2142_v54 = vpack.c.bf16 %v1149_v49, %v1141_v47  ;;  %v1140_v55 = vld [vmem:[%s3065_s27 + $0x280] sm:$0xff]  ;;  %v1142_v57 = vld [vmem:[%s3065_s27 + $0x290] sm:$0xff]  ;;  %p2626_p8 = pneg (%p1046_p9), %p2625_p1 }
 0x1d1   : >> { %2199 = vmatprep.subr.bf16.mxu1 %v2198_v33  ;;  %v1151_v51 = vld [vmem:[%s3065_s27 + $0x2d8] sm:$0xff]  ;;  %v1148_v56 = vld [vmem:[%s3065_s27 + $0x2c0] sm:$0xff]  ;;  %v1150_v59 = vld [vmem:[%s3065_s27 + $0x2d0] sm:$0xff] }
 0x1d2   : >> { %v2206_v58 = vpack.c.bf16 %v1151_v51, %v1143_v50  ;;  %v1157_v61 = vld [vmem:[%s3065_s27 + $0x308] sm:$0xff]  ;;  %v1159_v1 = vld [vmem:[%s3065_s27 + $0x318] sm:$0xff]  ;;  %v2144_v3 = vpack.c.bf16 %v1148_v56, %v1140_v55  ;;  %v2208_v4 = vpack.c.bf16 %v1150_v59, %v1142_v57  ;;  %v1156_v6 = vld [vmem:[%s3065_s27 + $0x300] sm:$0xff] }
 0x1d3   : >> { %2137 = vmatpush1.bf16.msra.mxu0 %v2136_v39  ;;  %v1165_v62 = vld [vmem:[%s3065_s27 + $0x348] sm:$0xff]  ;;  %v1167_v2 = vld [vmem:[%s3065_s27 + $0x358] sm:$0xff]  ;;  %v1164_v7 = vld [vmem:[%s3065_s27 + $0x340] sm:$0xff] }
 0x1d4   : >> { %2201 = vmatpush1.bf16.msra.mxu1 %v2200_v40  ;;  %2139 = vmatprep.subr.bf16.mxu0 %v2138_v41  ;;  %v2146_v5 = vpack.c.bf16 %v1165_v62, %v1157_v61  ;;  %v1158_v8 = vld [vmem:[%s3065_s27 + $0x310] sm:$0xff]  ;;  %v2210_v9 = vpack.c.bf16 %v1167_v2, %v1159_v1  ;;  %v1173_v12 = vld [vmem:[%s3065_s27 + $0x388] sm:$0xff]  ;;  %v1175_v14 = vld [vmem:[%s3065_s27 + $0x398] sm:$0xff]  ;;  %v2148_v17 = vpack.c.bf16 %v1164_v7, %v1156_v6 }
 0x1d5   : >> { %2203 = vmatprep.subr.bf16.mxu1 %v2202_v45  ;;  %v1166_v11 = vld [vmem:[%s3065_s27 + $0x350] sm:$0xff]  ;;  %v1181_v13 = vld [vmem:[%s3065_s27 + $0x3c8] sm:$0xff]  ;;  %v1183_v15 = vld [vmem:[%s3065_s27 + $0x3d8] sm:$0xff] }
 0x1d6   : >> { %v2212_v18 = vpack.c.bf16 %v1166_v11, %v1158_v8  ;;  %v2150_v19 = vpack.c.bf16 %v1181_v13, %v1173_v12  ;;  %v1172_v20 = vld [vmem:[%s3065_s27 + $0x380] sm:$0xff]  ;;  %v1174_v22 = vld [vmem:[%s3065_s27 + $0x390] sm:$0xff]  ;;  %v2214_v23 = vpack.c.bf16 %v1183_v15, %v1175_v14  ;;  %v1189_v25 = vld [vmem:[%s3065_s27 + $0x408] sm:$0xff] }
 0x1d7   : >> { %2141 = vmatpush1.bf16.msra.mxu0 %v2140_v52  ;;  %v1180_v21 = vld [vmem:[%s3065_s27 + $0x3c0] sm:$0xff]  ;;  %v1182_v24 = vld [vmem:[%s3065_s27 + $0x3d0] sm:$0xff]  ;;  %v1197_v26 = vld [vmem:[%s3065_s27 + $0x448] sm:$0xff] }
 0x1d8   : >> { %2205 = vmatpush1.bf16.msra.mxu1 %v2204_v53  ;;  %2143 = vmatprep.subr.bf16.mxu0 %v2142_v54  ;;  %v1191_v27 = vld [vmem:[%s3065_s27 + $0x418] sm:$0xff]  ;;  %v2152_v30 = vpack.c.bf16 %v1180_v21, %v1172_v20  ;;  %v2216_v31 = vpack.c.bf16 %v1182_v24, %v1174_v22  ;;  %v2154_v16 = vpack.c.bf16 %v1197_v26, %v1189_v25  ;;  %v1188_v32 = vld [vmem:[%s3065_s27 + $0x400] sm:$0xff]  ;;  %v1190_v33 = vld [vmem:[%s3065_s27 + $0x410] sm:$0xff] }
 0x1d9   : >> { %2207 = vmatprep.subr.bf16.mxu1 %v2206_v58  ;;  %v1199_v29 = vld [vmem:[%s3065_s27 + $0x458] sm:$0xff]  ;;  %v1196_v28 = vld [vmem:[%s3065_s27 + $0x440] sm:$0xff]  ;;  %v1198_v34 = vld [vmem:[%s3065_s27 + $0x450] sm:$0xff] }
 0x1da   : >> { %v2218_v60 = vpack.c.bf16 %v1199_v29, %v1191_v27  ;;  %v1205_v36 = vld [vmem:[%s3065_s27 + $0x488] sm:$0xff]  ;;  %v1207_v0 = vld [vmem:[%s3065_s27 + $0x498] sm:$0xff]  ;;  %v2156_v39 = vpack.c.bf16 %v1196_v28, %v1188_v32  ;;  %v2220_v40 = vpack.c.bf16 %v1198_v34, %v1190_v33  ;;  %v1204_v42 = vld [vmem:[%s3065_s27 + $0x480] sm:$0xff] }
 0x1db   : >> { %2145 = vmatpush1.bf16.msra.mxu0 %v2144_v3  ;;  %v1213_v37 = vld [vmem:[%s3065_s27 + $0x4c8] sm:$0xff]  ;;  %v1215_v38 = vld [vmem:[%s3065_s27 + $0x4d8] sm:$0xff]  ;;  %v1212_v43 = vld [vmem:[%s3065_s27 + $0x4c0] sm:$0xff] }
 0x1dc   : >> { %2209 = vmatpush1.bf16.msra.mxu1 %v2208_v4  ;;  %2147 = vmatprep.subr.bf16.mxu0 %v2146_v5  ;;  %v2158_v41 = vpack.c.bf16 %v1213_v37, %v1205_v36  ;;  %v1206_v44 = vld [vmem:[%s3065_s27 + $0x490] sm:$0xff]  ;;  %v2222_v45 = vpack.c.bf16 %v1215_v38, %v1207_v0  ;;  %v1221_v47 = vld [vmem:[%s3065_s27 + $0x508] sm:$0xff]  ;;  %v1223_v50 = vld [vmem:[%s3065_s27 + $0x518] sm:$0xff]  ;;  %v2160_v52 = vpack.c.bf16 %v1212_v43, %v1204_v42 }
 0x1dd   : >> { %2211 = vmatprep.subr.bf16.mxu1 %v2210_v9  ;;  %v1214_v46 = vld [vmem:[%s3065_s27 + $0x4d0] sm:$0xff]  ;;  %v1229_v49 = vld [vmem:[%s3065_s27 + $0x548] sm:$0xff]  ;;  %v1231_v51 = vld [vmem:[%s3065_s27 + $0x558] sm:$0xff] }
 0x1de   : >> { %v2224_v53 = vpack.c.bf16 %v1214_v46, %v1206_v44  ;;  %v2162_v54 = vpack.c.bf16 %v1229_v49, %v1221_v47  ;;  %v1220_v55 = vld [vmem:[%s3065_s27 + $0x500] sm:$0xff]  ;;  %v1222_v57 = vld [vmem:[%s3065_s27 + $0x510] sm:$0xff]  ;;  %v2226_v58 = vpack.c.bf16 %v1231_v51, %v1223_v50  ;;  %v1237_v61 = vld [vmem:[%s3065_s27 + $0x588] sm:$0xff] }
 0x1df   : >> { %2149 = vmatpush1.bf16.msra.mxu0 %v2148_v17  ;;  %v1228_v56 = vld [vmem:[%s3065_s27 + $0x540] sm:$0xff]  ;;  %v1230_v59 = vld [vmem:[%s3065_s27 + $0x550] sm:$0xff]  ;;  %v1245_v62 = vld [vmem:[%s3065_s27 + $0x5c8] sm:$0xff] }
 0x1e0   : >> { %2213 = vmatpush1.bf16.msra.mxu1 %v2212_v18  ;;  %2151 = vmatprep.subr.bf16.mxu0 %v2150_v19  ;;  %v1239_v1 = vld [vmem:[%s3065_s27 + $0x598] sm:$0xff]  ;;  %v2164_v3 = vpack.c.bf16 %v1228_v56, %v1220_v55  ;;  %v2228_v4 = vpack.c.bf16 %v1230_v59, %v1222_v57  ;;  %v2166_v5 = vpack.c.bf16 %v1245_v62, %v1237_v61  ;;  %v1236_v6 = vld [vmem:[%s3065_s27 + $0x580] sm:$0xff]  ;;  %v1238_v8 = vld [vmem:[%s3065_s27 + $0x590] sm:$0xff] }
 0x1e1   : >> { %2215 = vmatprep.subr.bf16.mxu1 %v2214_v23  ;;  %v1247_v2 = vld [vmem:[%s3065_s27 + $0x5d8] sm:$0xff]  ;;  %v1244_v7 = vld [vmem:[%s3065_s27 + $0x5c0] sm:$0xff]  ;;  %v1246_v11 = vld [vmem:[%s3065_s27 + $0x5d0] sm:$0xff] }
 0x1e2   : >> { %v2230_v9 = vpack.c.bf16 %v1247_v2, %v1239_v1  ;;  %v1253_v12 = vld [vmem:[%s3065_s27 + $0x608] sm:$0xff]  ;;  %v1255_v14 = vld [vmem:[%s3065_s27 + $0x618] sm:$0xff]  ;;  %v2168_v17 = vpack.c.bf16 %v1244_v7, %v1236_v6  ;;  %v2232_v18 = vpack.c.bf16 %v1246_v11, %v1238_v8  ;;  %v1252_v20 = vld [vmem:[%s3065_s27 + $0x600] sm:$0xff] }
 0x1e3   : >> { %2153 = vmatpush1.bf16.msra.mxu0 %v2152_v30  ;;  %v1261_v13 = vld [vmem:[%s3065_s27 + $0x648] sm:$0xff]  ;;  %v1263_v15 = vld [vmem:[%s3065_s27 + $0x658] sm:$0xff]  ;;  %v1260_v21 = vld [vmem:[%s3065_s27 + $0x640] sm:$0xff] }
 0x1e4   : >> { %2217 = vmatpush1.bf16.msra.mxu1 %v2216_v31  ;;  %2155 = vmatprep.subr.bf16.mxu0 %v2154_v16  ;;  %v2170_v19 = vpack.c.bf16 %v1261_v13, %v1253_v12  ;;  %v1254_v22 = vld [vmem:[%s3065_s27 + $0x610] sm:$0xff]  ;;  %v2234_v23 = vpack.c.bf16 %v1263_v15, %v1255_v14  ;;  %v1269_v25 = vld [vmem:[%s3065_s27 + $0x688] sm:$0xff]  ;;  %v1271_v27 = vld [vmem:[%s3065_s27 + $0x698] sm:$0xff]  ;;  %v2172_v30 = vpack.c.bf16 %v1260_v21, %v1252_v20 }
 0x1e5   : >> { %2219 = vmatprep.subr.bf16.mxu1 %v2218_v60  ;;  %v1262_v24 = vld [vmem:[%s3065_s27 + $0x650] sm:$0xff]  ;;  %v1277_v26 = vld [vmem:[%s3065_s27 + $0x6c8] sm:$0xff]  ;;  %v1279_v29 = vld [vmem:[%s3065_s27 + $0x6d8] sm:$0xff] }
 0x1e6   : >> { %v2236_v31 = vpack.c.bf16 %v1262_v24, %v1254_v22  ;;  %v2174_v16 = vpack.c.bf16 %v1277_v26, %v1269_v25  ;;  %v1268_v32 = vld [vmem:[%s3065_s27 + $0x680] sm:$0xff]  ;;  %v1270_v33 = vld [vmem:[%s3065_s27 + $0x690] sm:$0xff]  ;;  %v2238_v60 = vpack.c.bf16 %v1279_v29, %v1271_v27  ;;  %v1285_v36 = vld [vmem:[%s3065_s27 + $0x708] sm:$0xff] }
 0x1e7   : >> { %2157 = vmatpush1.bf16.msra.mxu0 %v2156_v39  ;;  %v1276_v28 = vld [vmem:[%s3065_s27 + $0x6c0] sm:$0xff]  ;;  %v1278_v34 = vld [vmem:[%s3065_s27 + $0x6d0] sm:$0xff]  ;;  %v1293_v37 = vld [vmem:[%s3065_s27 + $0x748] sm:$0xff] }
 0x1e8   : >> { %2221 = vmatpush1.bf16.msra.mxu1 %v2220_v40  ;;  %2159 = vmatprep.subr.bf16.mxu0 %v2158_v41  ;;  %v1287_v0 = vld [vmem:[%s3065_s27 + $0x718] sm:$0xff]  ;;  %v2176_v39 = vpack.c.bf16 %v1276_v28, %v1268_v32  ;;  %v2240_v40 = vpack.c.bf16 %v1278_v34, %v1270_v33  ;;  %v2178_v41 = vpack.c.bf16 %v1293_v37, %v1285_v36  ;;  %v1284_v42 = vld [vmem:[%s3065_s27 + $0x700] sm:$0xff]  ;;  %v1286_v44 = vld [vmem:[%s3065_s27 + $0x710] sm:$0xff] }
 0x1e9   : >> { %2223 = vmatprep.subr.bf16.mxu1 %v2222_v45  ;;  %v1295_v38 = vld [vmem:[%s3065_s27 + $0x758] sm:$0xff]  ;;  %v1292_v43 = vld [vmem:[%s3065_s27 + $0x740] sm:$0xff]  ;;  %v1294_v46 = vld [vmem:[%s3065_s27 + $0x750] sm:$0xff] }
 0x1ea   : >> { %v2242_v45 = vpack.c.bf16 %v1295_v38, %v1287_v0  ;;  %v1301_v47 = vld [vmem:[%s3065_s27 + $0x788] sm:$0xff]  ;;  %v1303_v50 = vld [vmem:[%s3065_s27 + $0x798] sm:$0xff]  ;;  %v1300_v55 = vld [vmem:[%s3065_s27 + $0x780] sm:$0xff] }
 0x1eb   : >> { %2161 = vmatpush1.bf16.msra.mxu0 %v2160_v52  ;;  %v1309_v49 = vld [vmem:[%s3065_s27 + $0x7c8] sm:$0xff]  ;;  %v1311_v51 = vld [vmem:[%s3065_s27 + $0x7d8] sm:$0xff]  ;;  %v2180_v52 = vpack.c.bf16 %v1292_v43, %v1284_v42  ;;  %v1308_v56 = vld [vmem:[%s3065_s27 + $0x7c0] sm:$0xff] }
 0x1ec   : >> { %2225 = vmatpush1.bf16.msra.mxu1 %v2224_v53  ;;  %2163 = vmatprep.subr.bf16.mxu0 %v2162_v54  ;;  %v2244_v53 = vpack.c.bf16 %v1294_v46, %v1286_v44  ;;  %v2182_v54 = vpack.c.bf16 %v1309_v49, %v1301_v47  ;;  %v1302_v57 = vld [vmem:[%s3065_s27 + $0x790] sm:$0xff]  ;;  %v1065_v61 = vld [vmem:[%s3065_s27 + $0x28] sm:$0xff]  ;;  %v1067_v1 = vld [vmem:[%s3065_s27 + $0x38] sm:$0xff] }
 0x1ed   : >> { %2227 = vmatprep.subr.bf16.mxu1 %v2226_v58  ;;  %v2246_v58 = vpack.c.bf16 %v1311_v51, %v1303_v50  ;;  %v1310_v59 = vld [vmem:[%s3065_s27 + $0x7d0] sm:$0xff]  ;;  %v1073_v62 = vld [vmem:[%s3065_s27 + $0x68] sm:$0xff]  ;;  %v1075_v2 = vld [vmem:[%s3065_s27 + $0x78] sm:$0xff] }
 0x1ee   : >> { %v1064_v6 = vld [vmem:[%s3065_s27 + $0x20] sm:$0xff]  ;;  %v1066_v8 = vld [vmem:[%s3065_s27 + $0x30] sm:$0xff]  ;;  %v1081_v12 = vld [vmem:[%s3065_s27 + $0xa8] sm:$0xff] }
 0x1ef   : >> { %2165 = vmatpush1.bf16.msra.mxu0 %v2164_v3  ;;  %v2184_v3 = vpack.c.bf16 %v1308_v56, %v1300_v55  ;;  %v1072_v7 = vld [vmem:[%s3065_s27 + $0x60] sm:$0xff]  ;;  %v1074_v11 = vld [vmem:[%s3065_s27 + $0x70] sm:$0xff]  ;;  %v1089_v13 = vld [vmem:[%s3065_s27 + $0xe8] sm:$0xff] }
 0x1f0   : >> { %2229 = vmatpush1.bf16.msra.mxu1 %v2228_v4  ;;  %2167 = vmatprep.subr.bf16.mxu0 %v2166_v5  ;;  %v2248_v4 = vpack.c.bf16 %v1310_v59, %v1302_v57  ;;  %v2250_v5 = vpack.c.bf16 %v1073_v62, %v1065_v61  ;;  %v1083_v14 = vld [vmem:[%s3065_s27 + $0xb8] sm:$0xff]  ;;  %v1080_v20 = vld [vmem:[%s3065_s27 + $0xa0] sm:$0xff]  ;;  %v1082_v22 = vld [vmem:[%s3065_s27 + $0xb0] sm:$0xff] }
 0x1f1   : >> { %2231 = vmatprep.subr.bf16.mxu1 %v2230_v9  ;;  %v2314_v9 = vpack.c.bf16 %v1075_v2, %v1067_v1  ;;  %v1091_v15 = vld [vmem:[%s3065_s27 + $0xf8] sm:$0xff]  ;;  %v1088_v21 = vld [vmem:[%s3065_s27 + $0xe0] sm:$0xff]  ;;  %v1090_v24 = vld [vmem:[%s3065_s27 + $0xf0] sm:$0xff] }
 0x1f2   : >> { %v1097_v25 = vld [vmem:[%s3065_s27 + $0x128] sm:$0xff]  ;;  %v1099_v27 = vld [vmem:[%s3065_s27 + $0x138] sm:$0xff]  ;;  %v1096_v32 = vld [vmem:[%s3065_s27 + $0x120] sm:$0xff] }
 0x1f3   : >> { %2169 = vmatpush1.bf16.msra.mxu0 %v2168_v17  ;;  %v2252_v17 = vpack.c.bf16 %v1072_v7, %v1064_v6  ;;  %v1105_v26 = vld [vmem:[%s3065_s27 + $0x168] sm:$0xff]  ;;  %v1107_v29 = vld [vmem:[%s3065_s27 + $0x178] sm:$0xff]  ;;  %v1104_v28 = vld [vmem:[%s3065_s27 + $0x160] sm:$0xff] }
 0x1f4   : >> { %2233 = vmatpush1.bf16.msra.mxu1 %v2232_v18  ;;  %2171 = vmatprep.subr.bf16.mxu0 %v2170_v19  ;;  %v2316_v18 = vpack.c.bf16 %v1074_v11, %v1066_v8  ;;  %v2254_v19 = vpack.c.bf16 %v1089_v13, %v1081_v12  ;;  %v1098_v33 = vld [vmem:[%s3065_s27 + $0x130] sm:$0xff]  ;;  %v1113_v36 = vld [vmem:[%s3065_s27 + $0x1a8] sm:$0xff]  ;;  %v1115_v0 = vld [vmem:[%s3065_s27 + $0x1b8] sm:$0xff] }
 0x1f5   : >> { %2235 = vmatprep.subr.bf16.mxu1 %v2234_v23  ;;  %v2318_v23 = vpack.c.bf16 %v1091_v15, %v1083_v14  ;;  %v1106_v34 = vld [vmem:[%s3065_s27 + $0x170] sm:$0xff]  ;;  %v1121_v37 = vld [vmem:[%s3065_s27 + $0x1e8] sm:$0xff]  ;;  %v1123_v38 = vld [vmem:[%s3065_s27 + $0x1f8] sm:$0xff] }
 0x1f6   : >> { %v1112_v42 = vld [vmem:[%s3065_s27 + $0x1a0] sm:$0xff]  ;;  %v1114_v44 = vld [vmem:[%s3065_s27 + $0x1b0] sm:$0xff]  ;;  %v1129_v47 = vld [vmem:[%s3065_s27 + $0x228] sm:$0xff] }
 0x1f7   : >> { %2173 = vmatpush1.bf16.msra.mxu0 %v2172_v30  ;;  %v2256_v30 = vpack.c.bf16 %v1088_v21, %v1080_v20  ;;  %v1120_v43 = vld [vmem:[%s3065_s27 + $0x1e0] sm:$0xff]  ;;  %v1122_v46 = vld [vmem:[%s3065_s27 + $0x1f0] sm:$0xff]  ;;  %v1131_v49 = vld [vmem:[%s3065_s27 + $0x238] sm:$0xff] }
 0x1f8   : >> { %2237 = vmatpush1.bf16.msra.mxu1 %v2236_v31  ;;  %2175 = vmatprep.subr.bf16.mxu0 %v2174_v16  ;;  %v2320_v31 = vpack.c.bf16 %v1090_v24, %v1082_v22  ;;  %v2258_v16 = vpack.c.bf16 %v1105_v26, %v1097_v25  ;;  %v1139_v50 = vld [vmem:[%s3065_s27 + $0x278] sm:$0xff]  ;;  %v2264_v51 = vpack.c.bf16 %v1120_v43, %v1112_v42  ;;  %v1136_v55 = vld [vmem:[%s3065_s27 + $0x260] sm:$0xff]  ;;  %v1130_v56 = vld [vmem:[%s3065_s27 + $0x230] sm:$0xff] }
 0x1f9   : >> { %2239 = vmatprep.subr.bf16.mxu1 %v2238_v60  ;;  %v2322_v60 = vpack.c.bf16 %v1107_v29, %v1099_v27  ;;  %v2330_v57 = vpack.c.bf16 %v1139_v50, %v1131_v49  ;;  %v1145_v59 = vld [vmem:[%s3065_s27 + $0x2a8] sm:$0xff]  ;;  %v1147_v62 = vld [vmem:[%s3065_s27 + $0x2b8] sm:$0xff]  ;;  %v1152_v6 = vld [vmem:[%s3065_s27 + $0x2e0] sm:$0xff] }
 0x1fa   : >> { %v1153_v61 = vld [vmem:[%s3065_s27 + $0x2e8] sm:$0xff]  ;;  %v1155_v1 = vld [vmem:[%s3065_s27 + $0x2f8] sm:$0xff]  ;;  %v1146_v7 = vld [vmem:[%s3065_s27 + $0x2b0] sm:$0xff] }
 0x1fb   : >> { %2177 = vmatpush1.bf16.msra.mxu0 %v2176_v39  ;;  %v2260_v39 = vpack.c.bf16 %v1104_v28, %v1096_v32  ;;  %v2334_v8 = vpack.c.bf16 %v1155_v1, %v1147_v62  ;;  %v1161_v11 = vld [vmem:[%s3065_s27 + $0x328] sm:$0xff]  ;;  %v1163_v13 = vld [vmem:[%s3065_s27 + $0x338] sm:$0xff]  ;;  %v1168_v20 = vld [vmem:[%s3065_s27 + $0x360] sm:$0xff] }
 0x1fc   : >> { %2241 = vmatpush1.bf16.msra.mxu1 %v2240_v40  ;;  %2179 = vmatprep.subr.bf16.mxu0 %v2178_v41  ;;  %v2324_v40 = vpack.c.bf16 %v1106_v34, %v1098_v33  ;;  %v2262_v41 = vpack.c.bf16 %v1121_v37, %v1113_v36  ;;  %v1169_v12 = vld [vmem:[%s3065_s27 + $0x368] sm:$0xff]  ;;  %v1171_v14 = vld [vmem:[%s3065_s27 + $0x378] sm:$0xff]  ;;  %v1162_v21 = vld [vmem:[%s3065_s27 + $0x330] sm:$0xff] }
 0x1fd   : >> { %2243 = vmatprep.subr.bf16.mxu1 %v2242_v45  ;;  %v2326_v45 = vpack.c.bf16 %v1123_v38, %v1115_v0  ;;  %v2338_v22 = vpack.c.bf16 %v1171_v14, %v1163_v13  ;;  %v1177_v24 = vld [vmem:[%s3065_s27 + $0x3a8] sm:$0xff]  ;;  %v1179_v26 = vld [vmem:[%s3065_s27 + $0x3b8] sm:$0xff]  ;;  %v1184_v32 = vld [vmem:[%s3065_s27 + $0x3e0] sm:$0xff] }
 0x1fe   : >> { %v1185_v25 = vld [vmem:[%s3065_s27 + $0x3e8] sm:$0xff]  ;;  %v1187_v27 = vld [vmem:[%s3065_s27 + $0x3f8] sm:$0xff]  ;;  %v1178_v28 = vld [vmem:[%s3065_s27 + $0x3b0] sm:$0xff] }
 0x1ff   : >> { %2181 = vmatpush1.bf16.msra.mxu0 %v2180_v52  ;;  %v2328_v52 = vpack.c.bf16 %v1122_v46, %v1114_v44  ;;  %v2342_v33 = vpack.c.bf16 %v1187_v27, %v1179_v26  ;;  %v1193_v34 = vld [vmem:[%s3065_s27 + $0x428] sm:$0xff]  ;;  %v1195_v37 = vld [vmem:[%s3065_s27 + $0x438] sm:$0xff]  ;;  %v1200_v42 = vld [vmem:[%s3065_s27 + $0x460] sm:$0xff] }
 0x200   : >> { %2245 = vmatpush1.bf16.msra.mxu1 %v2244_v53  ;;  %2183 = vmatprep.subr.bf16.mxu0 %v2182_v54  ;;  %v1128_v54 = vld [vmem:[%s3065_s27 + $0x220] sm:$0xff]  ;;  %v1201_v36 = vld [vmem:[%s3065_s27 + $0x468] sm:$0xff]  ;;  %v1203_v0 = vld [vmem:[%s3065_s27 + $0x478] sm:$0xff] }
 0x201   : >> { %2247 = vmatprep.subr.bf16.mxu1 %v2246_v58  ;;  %v1138_v58 = vld [vmem:[%s3065_s27 + $0x270] sm:$0xff]  ;;  %v2268_v2 = vpack.c.bf16 %v1136_v55, %v1128_v54  ;;  %v2346_v44 = vpack.c.bf16 %v1203_v0, %v1195_v37  ;;  %v1209_v46 = vld [vmem:[%s3065_s27 + $0x4a8] sm:$0xff]  ;;  %v1219_v49 = vld [vmem:[%s3065_s27 + $0x4f8] sm:$0xff] }
 0x202   : >> { %v1194_v43 = vld [vmem:[%s3065_s27 + $0x430] sm:$0xff]  ;;  %v1216_v54 = vld [vmem:[%s3065_s27 + $0x4e0] sm:$0xff]  ;;  %v1235_v62 = vld [vmem:[%s3065_s27 + $0x578] sm:$0xff] }
 0x203   : >> { %2185 = vmatpush1.bf16.msra.mxu0 %v2184_v3  ;;  %v2332_v3 = vpack.c.bf16 %v1138_v58, %v1130_v56  ;;  %v1210_v55 = vld [vmem:[%s3065_s27 + $0x4b0] sm:$0xff]  ;;  %v1225_v58 = vld [vmem:[%s3065_s27 + $0x528] sm:$0xff]  ;;  %v1251_v13 = vld [vmem:[%s3065_s27 + $0x5f8] sm:$0xff] }
 0x204   : >> { %2249 = vmatpush1.bf16.msra.mxu1 %v2248_v4  ;;  %2251 = vmatprep.subr.bf16.mxu0 %v2250_v5  ;;  %v2270_v4 = vpack.c.bf16 %v1153_v61, %v1145_v59  ;;  %v1144_v5 = vld [vmem:[%s3065_s27 + $0x2a0] sm:$0xff]  ;;  %v1233_v59 = vld [vmem:[%s3065_s27 + $0x568] sm:$0xff]  ;;  %v1227_v61 = vld [vmem:[%s3065_s27 + $0x538] sm:$0xff] }
 0x205   : >> { %2315 = vmatprep.subr.bf16.mxu1 %v2314_v9  ;;  %v1154_v9 = vld [vmem:[%s3065_s27 + $0x2f0] sm:$0xff]  ;;  %v2272_v15 = vpack.c.bf16 %v1152_v6, %v1144_v5  ;;  %v1232_v5 = vld [vmem:[%s3065_s27 + $0x560] sm:$0xff]  ;;  %v1267_v26 = vld [vmem:[%s3065_s27 + $0x678] sm:$0xff] }
 0x206   : >> { %1392 = vmatmul.mubr.f32.vlgmr.msra.gmra.mrb[0].mxu0 %v3288_v63  ;;  %v1226_v6 = vld [vmem:[%s3065_s27 + $0x530] sm:$0xff]  ;;  %v1283_v37 = vld [vmem:[%s3065_s27 + $0x6f8] sm:$0xff] }
 0x207   : >> { %1463 = vmatmul.mubr.f32.vlgmr.msra.gmra.mrb[0].mxu1 %v3288_v63  ;;  %2253 = vmatpush1.bf16.msra.mxu0 %v2252_v17  ;;  %v2336_v17 = vpack.c.bf16 %v1154_v9, %v1146_v7  ;;  %v2354_v7 = vpack.c.bf16 %v1235_v62, %v1227_v61  ;;  %v1241_v9 = vld [vmem:[%s3065_s27 + $0x5a8] sm:$0xff]  ;;  %v1315_v61 = vld [vmem:[%s3065_s27 + $0x7f8] sm:$0xff] }
 0x208   : >> { %2317 = vmatpush1.bf16.msra.mxu1 %v2316_v18  ;;  %2255 = vmatprep.subr.bf16.mxu0 %v2254_v19  ;;  %v2274_v18 = vpack.c.bf16 %v1169_v12, %v1161_v11  ;;  %v1160_v19 = vld [vmem:[%s3065_s27 + $0x320] sm:$0xff]  ;;  %v1249_v11 = vld [vmem:[%s3065_s27 + $0x5e8] sm:$0xff]  ;;  %v1243_v12 = vld [vmem:[%s3065_s27 + $0x5b8] sm:$0xff] }
 0x209   : >> { %2319 = vmatprep.subr.bf16.mxu1 %v2318_v23  ;;  %1533 = vmatprep.mubr.f32.mxu0 %v3298_v10  ;;  %v1170_v23 = vld [vmem:[%s3065_s27 + $0x370] sm:$0xff]  ;;  %v2276_v29 = vpack.c.bf16 %v1168_v20, %v1160_v19  ;;  %v1248_v19 = vld [vmem:[%s3065_s27 + $0x5e0] sm:$0xff] }
 0x20a   : >> { %1604 = vmatprep.mubr.f32.mxu1 %v3298_v10  ;;  %v1137_v10 = vld [vmem:[%s3065_s27 + $0x268] sm:$0xff]  ;;  %v1242_v20 = vld [vmem:[%s3065_s27 + $0x5b0] sm:$0xff] }
 0x20b   : >> { %2257 = vmatpush1.bf16.msra.mxu0 %v2256_v30  ;;  %v2266_v53 = vpack.c.bf16 %v1137_v10, %v1129_v47  ;;  %v2340_v30 = vpack.c.bf16 %v1170_v23, %v1162_v21  ;;  %v1217_v47 = vld [vmem:[%s3065_s27 + $0x4e8] sm:$0xff]  ;;  %v1211_v10 = vld [vmem:[%s3065_s27 + $0x4b8] sm:$0xff]  ;;  %v2358_v21 = vpack.c.bf16 %v1251_v13, %v1243_v12 }
 0x20c   : >> { %2321 = vmatpush1.bf16.msra.mxu1 %v2320_v31  ;;  %2259 = vmatprep.subr.bf16.mxu0 %v2258_v16  ;;  %v2278_v31 = vpack.c.bf16 %v1185_v25, %v1177_v24  ;;  %v1176_v16 = vld [vmem:[%s3065_s27 + $0x3a0] sm:$0xff]  ;;  %v2350_v56 = vpack.c.bf16 %v1219_v49, %v1211_v10  ;;  %v1257_v23 = vld [vmem:[%s3065_s27 + $0x628] sm:$0xff]  ;;  %v1259_v25 = vld [vmem:[%s3065_s27 + $0x638] sm:$0xff] }
 0x20d   : >> { %2323 = vmatprep.subr.bf16.mxu1 %v2322_v60  ;;  %v1186_v60 = vld [vmem:[%s3065_s27 + $0x3f0] sm:$0xff]  ;;  %v2280_v38 = vpack.c.bf16 %v1184_v32, %v1176_v16  ;;  %v1265_v24 = vld [vmem:[%s3065_s27 + $0x668] sm:$0xff]  ;;  %v1264_v16 = vld [vmem:[%s3065_s27 + $0x660] sm:$0xff] }
 0x20e   : >> { %v1258_v32 = vld [vmem:[%s3065_s27 + $0x630] sm:$0xff]  ;;  %v1299_v10 = vld [vmem:[%s3065_s27 + $0x778] sm:$0xff] }
 0x20f   : >> { %2261 = vmatpush1.bf16.msra.mxu0 %v2260_v39  ;;  %v2344_v39 = vpack.c.bf16 %v1186_v60, %v1178_v28  ;;  %v2362_v28 = vpack.c.bf16 %v1267_v26, %v1259_v25  ;;  %v1273_v60 = vld [vmem:[%s3065_s27 + $0x6a8] sm:$0xff] }
 0x210   : >> { %2325 = vmatpush1.bf16.msra.mxu1 %v2324_v40  ;;  %2263 = vmatprep.subr.bf16.mxu0 %v2262_v41  ;;  %v2282_v40 = vpack.c.bf16 %v1201_v36, %v1193_v34  ;;  %v1192_v41 = vld [vmem:[%s3065_s27 + $0x420] sm:$0xff]  ;;  %v1281_v34 = vld [vmem:[%s3065_s27 + $0x6e8] sm:$0xff]  ;;  %v1275_v36 = vld [vmem:[%s3065_s27 + $0x6b8] sm:$0xff] }
 0x211   : >> { %2327 = vmatprep.subr.bf16.mxu1 %v2326_v45  ;;  %v1202_v45 = vld [vmem:[%s3065_s27 + $0x470] sm:$0xff]  ;;  %v2284_v50 = vpack.c.bf16 %v1200_v42, %v1192_v41  ;;  %v1280_v41 = vld [vmem:[%s3065_s27 + $0x6e0] sm:$0xff] }
 0x212   : >> { %v1274_v42 = vld [vmem:[%s3065_s27 + $0x6b0] sm:$0xff] }
 0x213   : >> { %2265 = vmatpush1.bf16.msra.mxu0 %v2264_v51  ;;  %v2348_v51 = vpack.c.bf16 %v1202_v45, %v1194_v43  ;;  %v2366_v43 = vpack.c.bf16 %v1283_v37, %v1275_v36  ;;  %v1289_v45 = vld [vmem:[%s3065_s27 + $0x728] sm:$0xff]  ;;  %v1059_v36 = vld [vmem:[%s1057_s7 + $0x8] sm:$0xff] }
 0x214   : >> { %2329 = vmatpush1.bf16.msra.mxu1 %v2328_v52  ;;  %2267 = vmatprep.subr.bf16.mxu0 %v2266_v53  ;;  %v2286_v52 = vpack.c.bf16 %v1217_v47, %v1209_v46  ;;  %v1208_v53 = vld [vmem:[%s3065_s27 + $0x4a0] sm:$0xff]  ;;  %v1297_v46 = vld [vmem:[%s3065_s27 + $0x768] sm:$0xff]  ;;  %v1291_v47 = vld [vmem:[%s3065_s27 + $0x738] sm:$0xff] }
 0x215   : >> { %2331 = vmatprep.subr.bf16.mxu1 %v2330_v57  ;;  %v1218_v57 = vld [vmem:[%s3065_s27 + $0x4f0] sm:$0xff]  ;;  %v2288_v1 = vpack.c.bf16 %v1216_v54, %v1208_v53  ;;  %v1296_v53 = vld [vmem:[%s3065_s27 + $0x760] sm:$0xff] }
 0x216   : >> { %v1290_v54 = vld [vmem:[%s3065_s27 + $0x730] sm:$0xff] }
 0x217   : >> { %2269 = vmatpush1.bf16.msra.mxu0 %v2268_v2  ;;  %v2352_v2 = vpack.c.bf16 %v1218_v57, %v1210_v55  ;;  %v2370_v55 = vpack.c.bf16 %v1299_v10, %v1291_v47  ;;  %v1305_v57 = vld [vmem:[%s3065_s27 + $0x7a8] sm:$0xff] }
 0x218   : >> { %2333 = vmatpush1.bf16.msra.mxu1 %v2332_v3  ;;  %2271 = vmatprep.subr.bf16.mxu0 %v2270_v4  ;;  %v2290_v3 = vpack.c.bf16 %v1233_v59, %v1225_v58  ;;  %v1224_v4 = vld [vmem:[%s3065_s27 + $0x520] sm:$0xff]  ;;  %v1313_v58 = vld [vmem:[%s3065_s27 + $0x7e8] sm:$0xff]  ;;  %v1307_v59 = vld [vmem:[%s3065_s27 + $0x7b8] sm:$0xff] }
 0x219   : >> { %2335 = vmatprep.subr.bf16.mxu1 %v2334_v8  ;;  %v1234_v8 = vld [vmem:[%s3065_s27 + $0x570] sm:$0xff]  ;;  %v2292_v14 = vpack.c.bf16 %v1232_v5, %v1224_v4  ;;  %v1312_v4 = vld [vmem:[%s3065_s27 + $0x7e0] sm:$0xff]  ;;  %v2374_v5 = vpack.c.bf16 %v1315_v61, %v1307_v59 }
 0x21b   : >> { %2273 = vmatpush1.bf16.msra.mxu0 %v2272_v15  ;;  %v2356_v15 = vpack.c.bf16 %v1234_v8, %v1226_v6  ;;  %v1306_v6 = vld [vmem:[%s3065_s27 + $0x7b0] sm:$0xff] }
 0x21c   : >> { %2337 = vmatpush1.bf16.msra.mxu1 %v2336_v17  ;;  %2275 = vmatprep.subr.bf16.mxu0 %v2274_v18  ;;  %v2294_v17 = vpack.c.bf16 %v1249_v11, %v1241_v9  ;;  %v1240_v18 = vld [vmem:[%s3065_s27 + $0x5a0] sm:$0xff] }
 0x21d   : >> { %2339 = vmatprep.subr.bf16.mxu1 %v2338_v22  ;;  %v1250_v22 = vld [vmem:[%s3065_s27 + $0x5f0] sm:$0xff]  ;;  %v2296_v27 = vpack.c.bf16 %v1248_v19, %v1240_v18 }
 0x21f   : >> { %2277 = vmatpush1.bf16.msra.mxu0 %v2276_v29  ;;  %v2360_v29 = vpack.c.bf16 %v1250_v22, %v1242_v20 }
 0x220   : >> { %2341 = vmatpush1.bf16.msra.mxu1 %v2340_v30  ;;  %2279 = vmatprep.subr.bf16.mxu0 %v2278_v31  ;;  %v2298_v30 = vpack.c.bf16 %v1265_v24, %v1257_v23  ;;  %v1256_v31 = vld [vmem:[%s3065_s27 + $0x620] sm:$0xff] }
 0x221   : >> { %2343 = vmatprep.subr.bf16.mxu1 %v2342_v33  ;;  %v1266_v33 = vld [vmem:[%s3065_s27 + $0x670] sm:$0xff]  ;;  %v2300_v0 = vpack.c.bf16 %v1264_v16, %v1256_v31 }
 0x223   : >> { %2281 = vmatpush1.bf16.msra.mxu0 %v2280_v38  ;;  %v2364_v38 = vpack.c.bf16 %v1266_v33, %v1258_v32 }
 0x224   : >> { %2345 = vmatpush1.bf16.msra.mxu1 %v2344_v39  ;;  %2283 = vmatprep.subr.bf16.mxu0 %v2282_v40  ;;  %v2302_v39 = vpack.c.bf16 %v1281_v34, %v1273_v60  ;;  %v1272_v40 = vld [vmem:[%s3065_s27 + $0x6a0] sm:$0xff] }
 0x225   : >> { %2347 = vmatprep.subr.bf16.mxu1 %v2346_v44  ;;  %v1282_v44 = vld [vmem:[%s3065_s27 + $0x6f0] sm:$0xff]  ;;  %v2304_v49 = vpack.c.bf16 %v1280_v41, %v1272_v40 }
 0x227   : >> { %2285 = vmatpush1.bf16.msra.mxu0 %v2284_v50  ;;  %v2368_v50 = vpack.c.bf16 %v1282_v44, %v1274_v42 }
 0x228   : >> { %2349 = vmatpush1.bf16.msra.mxu1 %v2348_v51  ;;  %2287 = vmatprep.subr.bf16.mxu0 %v2286_v52  ;;  %v2306_v51 = vpack.c.bf16 %v1297_v46, %v1289_v45  ;;  %v1288_v52 = vld [vmem:[%s3065_s27 + $0x720] sm:$0xff] }
 0x229   : >> { %2351 = vmatprep.subr.bf16.mxu1 %v2350_v56  ;;  %v1298_v56 = vld [vmem:[%s3065_s27 + $0x770] sm:$0xff]  ;;  %v2308_v62 = vpack.c.bf16 %v1296_v53, %v1288_v52 }
 0x22b   : >> { %2289 = vmatpush1.bf16.msra.mxu0 %v2288_v1  ;;  %v2372_v1 = vpack.c.bf16 %v1298_v56, %v1290_v54 }
 0x22c   : >> { %2353 = vmatpush1.bf16.msra.mxu1 %v2352_v2  ;;  %2291 = vmatprep.subr.bf16.mxu0 %v2290_v3  ;;  %v2310_v2 = vpack.c.bf16 %v1313_v58, %v1305_v57  ;;  %v1304_v3 = vld [vmem:[%s3065_s27 + $0x7a0] sm:$0xff] }
 0x22d   : >> { %2355 = vmatprep.subr.bf16.mxu1 %v2354_v7  ;;  %v1314_v7 = vld [vmem:[%s3065_s27 + $0x7f0] sm:$0xff]  ;;  %v2312_v8 = vpack.c.bf16 %v1312_v4, %v1304_v3  ;;  %s3585_s27 = scalar_lea.hbm (%p1046_p9), %s3695_s5, %s3573_s9 }
 0x22e   : >> { %v2376_v9 = vpack.c.bf16 %v1314_v7, %v1306_v6 }
 0x22f   : >> { %2293 = vmatpush1.bf16.msra.mxu0 %v2292_v14 }
 0x230   : >> { %2357 = vmatpush1.bf16.msra.mxu1 %v2356_v15  ;;  %2295 = vmatprep.subr.bf16.mxu0 %v2294_v17 }
 0x231   : >> { %2359 = vmatprep.subr.bf16.mxu1 %v2358_v21  ;;  %v1058_v21 = vld [vmem:[%s1057_s7] sm:$0xff]  ;;  %s2627_s7 = sshll.u32 (%p1046_p9), %s2793_s29, 4  ;;  %s2628_s7 = int_to_ptr.vmem [resolvable:$false] %s2627_s7 }
 0x232   : > { %s2629_s14 = scalar_lea.vmem (%p1046_p9), %s2628_s7, 128  ;;  %p2630_p5 = scmp.lt.s32.totalorder (%p1046_p9), %s3588_s15, %s2628_s7 }
 0x233   : >> { %2297 = vmatpush1.bf16.msra.mxu0 %v2296_v27  ;;  %p2631_p11 = scmp.lt.s32.totalorder (%p1046_p9), %s2629_s14, %s2623_s13 }
 0x234   : >> { %2361 = vmatpush1.bf16.msra.mxu1 %v2360_v29  ;;  %2299 = vmatprep.subr.bf16.mxu0 %v2298_v30 }
 0x235   : >> { %2363 = vmatprep.subr.bf16.mxu1 %v2362_v28  ;;  %p2632_p2 = por (%p1046_p9), %p2631_p11, %p2630_p5 }
 0x237   : >> { %2301 = vmatpush1.bf16.msra.mxu0 %v2300_v0  ;;  %p2633_p13 = pnand (%p1046_p9), %p2632_p2, %p2626_p8 }
 0x238   : >> { %2365 = vmatpush1.bf16.msra.mxu1 %v2364_v38  ;;  %2303 = vmatprep.subr.bf16.mxu0 %v2302_v39 }
 0x239   : >> { %2367 = vmatprep.subr.bf16.mxu1 %v2366_v43 }
 0x23b   : >> { %2305 = vmatpush1.bf16.msra.mxu0 %v2304_v49 }
 0x23c   : >> { %2369 = vmatpush1.bf16.msra.mxu1 %v2368_v50  ;;  %2307 = vmatprep.subr.bf16.mxu0 %v2306_v51 }
 0x23d   : >> { %2371 = vmatprep.subr.bf16.mxu1 %v2370_v55 }
 0x23f   : >> { %2309 = vmatpush1.bf16.msra.mxu0 %v2308_v62 }
 0x240   : >> { %2373 = vmatpush1.bf16.msra.mxu1 %v2372_v1  ;;  %2311 = vmatprep.subr.bf16.mxu0 %v2310_v2 }
 0x241   : >> { %2375 = vmatprep.subr.bf16.mxu1 %v2374_v5 }
 0x243   : >> { %2313 = vmatpush1.bf16.msra.mxu0 %v2312_v8 }
 0x244   : >> { %2377 = vmatpush1.bf16.msra.mxu1 %v2376_v9 }
 0x246   : >> { %1534 = vmatmul.mubr.f32.vlgmr.msra.gmra.mrb[2].mxu0 %v3288_v63 }
 0x247   : >> { %1605 = vmatmul.mubr.f32.vlgmr.msra.gmra.mrb[2].mxu1 %v3288_v63 }
 0x2d9   : >> { %v1393_v11 = vpop.f32.mrb[0].mxu0 }
 0x2da   : >> { %v1464_v12 = vpop.f32.mrb[0].mxu1  ;;  %v1395_v13 = vpop.f32.mrb[1].mxu0 }
 0x2db   : >> { %v1619_v14 = vcombine.low %v1393_v11, %v1395_v13  ;;  %v1466_v15 = vpop.f32.mrb[1].mxu1 }
 0x2dc   : >> { %v1620_v17 = vcombine.low %v1464_v12, %v1466_v15 }
 0x2dd   : >> { %v1627_v18 = vrot.slane %v1619_v14, %v3141_v35 }
 0x2de   : >> { %v1634_v19 = vrot.slane %v1620_v17, %v3141_v35 }
 0x2e0   : >> { %v1635_v20 = vcombine.low %v1627_v18, %v1634_v19 }
 0x2e2   : >> { %v1655_v63 = vadd.f32 %v1635_v20, %v1058_v21 }
 0x2e4   : >> { %v1664_v22 = vrot.slane %v1655_v63, 4  ;;  %v1971_v24 = vmul.f32 -1.442695, %v1655_v63 }
 0x2e6   : >> { %v1972_v23 = vmul.f32 -1.442695, %v1664_v22 }
 0x2e8   : >> { %2489 = vpow2.f32 %v1972_v23 }
 0x2e9   : >> { %2491 = vpow2.f32 %v1971_v24 }
 0x2f2   : >> { %v2490_v29 = vpop.eup %2489 }
 0x2f3   : >> { %v2492_v16 = vpop.eup %2491  ;;  %v1669_v33 = vadd.f32 1.0, %v2490_v29 }
 0x2f4   : >> { %v1660_v34 = vadd.f32 1.0, %v2492_v16 }
 0x2f5   : >> { %2493 = vrcp.f32 %v1669_v33 }
 0x2f6   : >> { %2495 = vrcp.f32 %v1660_v34 }
 0x2ff   : >> { %v2494_v40 = vpop.eup %2493 }
 0x300   : >> { %v2496_v41 = vpop.eup %2495  ;;  %v1682_v43 = vmul.f32 %v2773_v48, %v2494_v40 }
 0x319   : >> { %v1535_v25 = vpop.f32.mrb[2].mxu0 }
 0x31a   : >> { %v1606_v26 = vpop.f32.mrb[2].mxu1  ;;  %v1537_v27 = vpop.f32.mrb[3].mxu0 }
 0x31b   : >> { %v1636_v30 = vcombine.low %v1535_v25, %v1537_v27  ;;  %v1608_v31 = vpop.f32.mrb[3].mxu1 }
 0x31c   : >> { %v1637_v32 = vcombine.low %v1606_v26, %v1608_v31 }
 0x31d   : >> { %v1644_v28 = vrot.slane %v1636_v30, %v3141_v35 }
 0x31e   : >> { %v1651_v60 = vrot.slane %v1637_v32, %v3141_v35 }
 0x320   : >> { %v1652_v37 = vcombine.low %v1644_v28, %v1651_v60 }
 0x322   : >> { %v1656_v0 = vadd.f32 %v1652_v37, %v1059_v36 }
 0x324   : >> { %2497 = vtanh.f32 %v1656_v0  ;;  %v1674_v38 = vrot.slane %v1656_v0, 4 }
 0x326   : >> { %v1973_v39 = vmul.f32 -1.442695, %v1674_v38 }
 0x328   : >> { %2499 = vpow2.f32 %v1973_v39 }
 0x32e   : >> { %v2498_v42 = vpop.eup %2497 }
 0x32f   : >> { %v1683_v44 = vmul.f32 %v2498_v42, %v2496_v41 }
 0x331   : >> { %v1684_v45 = vadd.f32 %v1683_v44, %v1682_v43  }
 0x332   : >> { %v2500_v46 = vpop.eup %2499 }
 0x333   : >> { %v1679_v47 = vadd.f32 1.0, %v2500_v46  ;;  %2501 = vtanh.f32 %v1684_v45  ;;  %v3737_v48 = vmov %v1684_v45  ;;  %1692 = vst [vmem:[%s3263_s23] sm:$0xf] (%p1046_p9), %v1684_v45 }
 0x335   : >> { %2503 = vrcp.f32 %v1679_v47 }
 0x33c   : > { %1048 = sbr.rel (!%p1046_p9) target bundleno = 450 (0x1c2), region = 151 }
 0x33d   : >> { %v2502_v10 = vpop.eup %2501 }
 0x33f   : >> { %v2504_v49 = vpop.eup %2503 }
 0x340   : >> { %v1686_v50 = vmul.f32 %v2504_v49, %v2502_v10  }
 0x342   : >> { %1690 = vst [vmem:[%s1689_s18] sm:$0xf] %v1686_v50  ;;  %v3738_v49 = vmov %v1686_v50  ;;  %1691 = vst [vmem:[%s3259_s10] sm:$0xf] (%p1046_p9), %v1686_v50 }
 0x343   : > { %2636 = shalt.err (!%p2633_p13)
}
 0x344   : > { %s2637_s16 = scalar_lea.hbm %s3585_s27, 64  ;;  %s2641_s18 = scalar_lea.hbm %s3695_s5, 128 }
 0x345   : > { %p2638_p0 = scmp.ne.s32.totalorder %s3585_s27, %s2637_s16  ;;  %p2642_p6 = scmp.lt.u32.totalorder %s3585_s27, %s3695_s5 }
 0x346   : > { %p2643_p4 = scmp.lt.u32.totalorder %s2641_s18, %s2637_s16  ;;  %p2645_p12 = scmp.lt.u32.totalorder %s2637_s16, %s3585_s27 }
 0x347   : > { %p2639_p10 = pnand %p2638_p0, %p3739_p3 }
 0x348   : > { %p2644_p9 = por %p2643_p4, %p2642_p6 }
 0x349   : > { %p2640_p7 = pneg %p2639_p10 }
 0x34a   : > { %p2646_p1 = por %p2645_p12, %p2644_p9 }
 0x34c   : > { %p2647_p8 = pnand %p2646_p1, %p2640_p7 }
 0x34e   : > { %2650 = shalt.err (!%p2647_p8)
}
 0x34f   : > { %2390 = dma.vmem_to_hbm [thread:$0]  (%p3739_p3), %s3588_s15, 64, %s3585_s27, %s3593_s30  }
 0x350   : > { %s1694_s25 = scalar_lea.sflag [#allocation5], %s3052_s26  ;;  %s2651_s1 = scalar_lea.vmem %s3619_s28, 384 }
 0x351   : > { %p2652_p5 = scmp.ne.s32.totalorder %s3619_s28, %s2651_s1  ;;  %s2794_s13 = smov [#allocation11]  }
 0x352   : > { %s2655_s29 = sshll.u32 %s2794_s13, 4  ;;  %s2656_s29 = int_to_ptr.vmem [resolvable:$false] %s2655_s29 }
 0x353   : > { %p2653_p11 = pnand %p2652_p5, %p3739_p3  ;;  %s2657_s7 = scalar_lea.vmem %s2656_s29, 768 }
 0x354   : > { %p2658_p13 = scmp.lt.s32.totalorder %s3619_s28, %s2656_s29  ;;  %p2659_p0 = scmp.lt.s32.totalorder %s2657_s7, %s2651_s1 }
 0x355   : > { %p2654_p2 = pneg %p2653_p11 }
 0x356   : > { %p2660_p10 = por %p2659_p0, %p2658_p13 }
 0x358   : > { %p2661_p7 = pnand %p2660_p10, %p2654_p2 }
 0x35a   : > { %2664 = shalt.err (!%p2661_p7)
}
 0x35b   : > { %s2665_s19 = scalar_lea.hbm %s3579_s8, 384  ;;  %s2669_s14 = scalar_lea.hbm %s3694_s4, 768 }
 0x35c   : > { %p2666_p6 = scmp.ne.s32.totalorder %s3579_s8, %s2665_s19  ;;  %p2670_p12 = scmp.lt.u32.totalorder %s3579_s8, %s3694_s4 }
 0x35d   : > { %p2671_p1 = scmp.lt.u32.totalorder %s2669_s14, %s2665_s19  ;;  %p2673_p5 = scmp.lt.u32.totalorder %s2665_s19, %s3579_s8 }
 0x35e   : > { %p2667_p4 = pnand %p2666_p6, %p3739_p3 }
 0x35f   : > { %p2672_p8 = por %p2671_p1, %p2670_p12 }
 0x360   : > { %p2668_p9 = pneg %p2667_p4 }
 0x361   : > { %p2674_p11 = por %p2673_p5, %p2672_p8 }
 0x363   : > { %p2675_p2 = pnand %p2674_p11, %p2668_p9 }
 0x365   : > { %2678 = shalt.err (!%p2675_p2)
}
 0x366   : > { %s2795_s10 = smov 64   ;;  %s2796_s18 = smov 128  }
 0x367   : > { %s2797_s20 = smov 4   ;;  %s3649_s13 = scalar_lea.hbm %s3696_s6, %s3573_s9 }
 0x368   : > { %2389 = dma.vmem_to_hbm [thread:$0]  (%p3739_p3), %s3619_s28, 384, %s3579_s8, %s1694_s25, %s2795_s10, %s2796_s18, %s2797_s20  }
 0x369   : > { %s1748_s29 = sshll.u32 %s3263_s23, 4  ;;  %s2798_s19 = smov [#allocation14]   ;;  %s1749_s29 = int_to_ptr.vmem [resolvable:$true] %s1748_s29 }
 0x36a   : > { %s2679_s7 = scalar_lea.vmem %s1749_s29, 64  ;;  %s2683_s27 = sshll.u32 %s2798_s19, 4  ;;  %s2684_s27 = int_to_ptr.vmem [resolvable:$false] %s2683_s27 }
 0x36b   : > { %p2680_p13 = scmp.ne.s32.totalorder %s1749_s29, %s2679_s7  ;;  %s2685_s15 = scalar_lea.vmem %s2684_s27, 128 }
 0x36c   : > { %p2686_p7 = scmp.lt.s32.totalorder %s1749_s29, %s2684_s27  ;;  %p2687_p6 = scmp.lt.s32.totalorder %s2685_s15, %s2679_s7 }
 0x36d   : > { %p2681_p0 = pnand %p2680_p13, %p3739_p3 }
 0x36e   : > { %p2688_p4 = por %p2687_p6, %p2686_p7 }
 0x36f   : > { %p2682_p10 = pneg %p2681_p0 }
 0x371   : > { %p2689_p9 = pnand %p2688_p4, %p2682_p10 }
 0x373   : > { %2692 = shalt.err (!%p2689_p9)
}
 0x374   : > { %s2693_s26 = scalar_lea.hbm %s3649_s13, 64  ;;  %s2697_s8 = scalar_lea.hbm %s3696_s6, 128 }
 0x375   : > { %p2694_p12 = scmp.ne.s32.totalorder %s3649_s13, %s2693_s26  ;;  %p2698_p5 = scmp.lt.u32.totalorder %s3649_s13, %s3696_s6 }
 0x376   : > { %p2699_p11 = scmp.lt.u32.totalorder %s2697_s8, %s2693_s26  ;;  %p2701_p13 = scmp.lt.u32.totalorder %s2693_s26, %s3649_s13 }
 0x377   : > { %p2695_p1 = pnand %p2694_p12, %p3739_p3 }
 0x378   : > { %p2700_p2 = por %p2699_p11, %p2698_p5 }
 0x379   : > { %p2696_p8 = pneg %p2695_p1 }
 0x37a   : > { %p2702_p0 = por %p2701_p13, %p2700_p2 }
 0x37c   : > { %p2703_p10 = pnand %p2702_p0, %p2696_p8 }
 0x37e   : > { %2706 = shalt.err (!%p2703_p10)
}
 0x37f   : > { %2391 = dma.vmem_to_hbm [thread:$0]  (%p3739_p3), %s1749_s29, 64, %s3649_s13, %s3593_s30  }
 0x380 PF: > { %s3740_s14 = sld [smem:[#allocation23_spill]]  ;;  %s1760_s16 = sand.u32 1, %s2757_s21  }
 0x381   : > { %p3742_p6 = scmp.ge.s32.totalorder %s2769_s24, 2  ;;  %s1761_s17 = scalar_lea.sflag [#allocation5], %s1760_s16 }
 0x386   : > { %p3741_p7 = scmp.ne.s32.totalorder %s3740_s14, 0 }
 0x388   : > { %p2410_p4 = pnand %p3742_p6, %p3741_p7 }
 0x38a   : > { %2748 = dma.done.wait (!%p2410_p4), %s1761_s17, 384  }
 0x38b   : > { %2750 = vsyncadd (!%p2410_p4), %s1761_s17, 4294966912  ;;  %s3743_s10 = sadd.s32 4294967294, %s2769_s24  }
 0x38c   : > { %s1769_s18 = sand.u32 1, %s3743_s10  }
 0x38d   : > { %s1770_s20 = scalar_lea.sflag [#allocation13], %s1769_s18 }
 0x38e   : > { %2752 = dma.done.wait (!%p2410_p4), %s1770_s20, 128  }
 0x38f   : > { %2754 = vsyncadd (!%p2410_p4), %s1770_s20, 4294967168  ;;  %s3744_s24 = sld [smem:[#allocation21_spill]]  ;;  %s3745_s11 = sld [smem:[#allocation20_spill]] }
 0x390   : > { %s3746_s23 = sld [smem:[#allocation22_spill]]  ;;  %s3747_s21 = smov %s2761_s22 }
 0x395   : > { %p27_p3 = scmp.ge.s32.totalorder %s3744_s24, 4   ;;  %s3748_s22 = smov %s3745_s11 }
 0x397   :  { %29 = sbr.rel (!%p27_p3) target bundleno = 12 (0xc), region = 162 }
 0x39e   :  { %1784 = vsyncpa [#allocation4], 1 }
 0x39f   :  { %1786 = vsyncpa [#allocation4 + $0x1], 1 }
 0x3a0   :  { %1787 = vsyncpa [#allocation7], 1 }
 0x3a1   :  { %1789 = vsyncpa [#allocation7 + $0x1], 1 }
 0x3a2   :  { %1790 = vsyncpa [#allocation10], 1 }
 0x3a3   :  { %1792 = vsyncpa [#allocation10 + $0x1], 1 }
 0x3a4   :  { %1793 = vsyncpa [#allocation5], 1 }
 0x3a5   :  { %1795 = vsyncpa [#allocation5 + $0x1], 1 }
 0x3a6   :  { %1796 = vsyncpa [#allocation13], 1 }
 0x3a7   :  { %1798 = vsyncpa [#allocation13 + $0x1], 1 }

</bundles_post_ra>
